<compile_context>
chip_gen: v6e
topology: v6e:2x2x1
jax: 0.10.0
libtpu: 0.0.40
codegen_flags: <defaults>
</compile_context>

<pallas_src>
import math

import jax
import jax.numpy as jnp
from jax.experimental import pallas as pl
from jax.experimental.pallas import tpu as pltpu


def lstm_reg_forward(x, wih0, whh0, b0, wih1, whh1, b1, wreg, breg):
    """x: (S, B, I) float32.  Weights pre-transposed:
       wih0 (I,4H), whh0 (H,4H), wih1 (H,4H), whh1 (H,4H), b* (1,4H),
       wreg (H,O), breg (1,O).  Returns (S, B, O) float32."""
    S, B, I = x.shape
    H = whh0.shape[0]
    O = wreg.shape[1]
    SB = S * B

    x2d = x.reshape(SB, I)                          # free reshape in XLA
    w1cat = jnp.concatenate([wih1, whh1], axis=0)   # (2H, 4H), built once on host/XLA

    def kernel(x2d_ref, wih0_ref, whh0_ref, b0_ref,
               w1cat_ref, b1_ref, wreg_ref, breg_ref,
               y_ref, h1all_ref):
        # ---- prologue: hoisted layer-0 input projection (one batched matmul) ----
        xp = (jnp.dot(x2d_ref[...], wih0_ref[...],
                      preferred_element_type=jnp.float32)
              + b0_ref[...])                        # (S*B, 4H), includes b_ih0+b_hh0

        # Hoist weight loads / bias broadcast out of the time loop.
        whh0_v = whh0_ref[...]                      # (H, 4H)
        w1c_v = w1cat_ref[...]                      # (2H, 4H)
        b1_v = jnp.broadcast_to(b1_ref[...], (B, 4 * H))

        def cell(gates, c_prev):
            # PyTorch gate order [i, f, g, o]
            i = jax.nn.sigmoid(gates[:, 0 * H:1 * H])
            f = jax.nn.sigmoid(gates[:, 1 * H:2 * H])
            g = jnp.tanh(gates[:, 2 * H:3 * H])
            o = jax.nn.sigmoid(gates[:, 3 * H:4 * H])
            c_new = f * c_prev + i * g
            h_new = o * jnp.tanh(c_new)
            return h_new, c_new

        z = jnp.zeros((B, H), jnp.float32)          # PyTorch default h0 = c0 = 0
        h0, c0, h1, c1 = z, z, z, z

        # Fully-unrolled static time loop: state stays in vregs, static slices,
        # full LLO scheduler visibility across timesteps.
        for t in range(S):
            # Layer 0: only the recurrent matmul remains on the serial path.
            g0 = xp[t * B:(t + 1) * B, :] + jnp.dot(
                h0, whh0_v, preferred_element_type=jnp.float32)
            h0, c0 = cell(g0, c0)

            # Layer 1: single fused matmul over concat([input, h_prev]).
            g1 = jnp.dot(jnp.concatenate([h0, h1], axis=-1), w1c_v,
                         preferred_element_type=jnp.float32) + b1_v
            h1, c1 = cell(g1, c1)

            # Stash h1_t for the batched regression head (static sublane store).
            h1all_ref[t * B:(t + 1) * B, :] = h1

        # ---- epilogue: one batched head matmul + a single output store ----
        y_ref[...] = (jnp.dot(h1all_ref[...], wreg_ref[...],
                              preferred_element_type=jnp.float32)
                      + breg_ref[...])

    def spec2d(shape):
        return pl.BlockSpec(shape, lambda i: (0, 0))

    in_specs = [
        spec2d((SB, I)),          # x, flattened to (S*B, I)
        spec2d((I, 4 * H)),       # W_ih layer 0
        spec2d((H, 4 * H)),       # W_hh layer 0
        spec2d((1, 4 * H)),       # bias layer 0 (b_ih + b_hh)
        spec2d((2 * H, 4 * H)),   # fused [W_ih1; W_hh1]
        spec2d((1, 4 * H)),       # bias layer 1
        spec2d((H, O)),           # linear head weight
        spec2d((1, O)),           # linear head bias
    ]
    out_spec = spec2d((SB, O))

    y2d = pl.pallas_call(
        kernel,
        out_shape=jax.ShapeDtypeStruct((SB, O), jnp.float32),
        grid_spec=pltpu.PrefetchScalarGridSpec(
            num_scalar_prefetch=0,
            grid=(1,),                                   # single kernel invocation
            in_specs=in_specs,
            out_specs=out_spec,
            scratch_shapes=[pltpu.VMEM((SB, H), jnp.float32)],  # h1 history
        ),
        compiler_params=pltpu.CompilerParams(
            dimension_semantics=("arbitrary",)),
    )(x2d, wih0, whh0, b0, w1cat, b1, wreg, breg)

    return y2d.reshape(S, B, O)


def lstm_reg_reference(x, wih0, whh0, b0, wih1, whh1, b1, wreg, breg):
    """Pure-JAX reference (lax.scan) with identical semantics."""
    S, B, I = x.shape
    H = whh0.shape[0]

    def cell(h, c, inp, wih, whh, b):
        gates = inp @ wih + h @ whh + b
        i = jax.nn.sigmoid(gates[:, 0 * H:1 * H])
        f = jax.nn.sigmoid(gates[:, 1 * H:2 * H])
        g = jnp.tanh(gates[:, 2 * H:3 * H])
        o = jax.nn.sigmoid(gates[:, 3 * H:4 * H])
        c = f * c + i * g
        h = o * jnp.tanh(c)
        return h, c

    def step(carry, x_t):
        (h0, c0, h1, c1) = carry
        h0, c0 = cell(h0, c0, x_t, wih0, whh0, b0)
        h1, c1 = cell(h1, c1, h0, wih1, whh1, b1)
        return (h0, c0, h1, c1), h1

    zeros = jnp.zeros((B, H), jnp.float32)
    _, hs = jax.lax.scan(step, (zeros, zeros, zeros, zeros), x)
    return hs @ wreg + breg  # (S, B, O)


if __name__ == "__main__":
    # Small shapes consistent with the module: seq=8, batch=2, input=4, hidden=32, out=1
    S, B, I, H, O = 8, 2, 4, 32, 1

    key = jax.random.PRNGKey(0)
    keys = jax.random.split(key, 11)
    bound = 1.0 / math.sqrt(H)

    def u(k, shape):
        return jax.random.uniform(k, shape, jnp.float32, -bound, bound)

    # PyTorch stores weight_ih_l{k} as (4H, in); pre-transpose for (in, 4H) matmuls.
    wih0 = u(keys[0], (4 * H, I)).T
    whh0 = u(keys[1], (4 * H, H)).T
    b0 = (u(keys[2], (4 * H,)) + u(keys[3], (4 * H,))).reshape(1, 4 * H)  # b_ih + b_hh
    wih1 = u(keys[4], (4 * H, H)).T
    whh1 = u(keys[5], (4 * H, H)).T
    b1 = (u(keys[6], (4 * H,)) + u(keys[7], (4 * H,))).reshape(1, 4 * H)
    wreg = u(keys[8], (O, H)).T                       # nn.Linear weight (O, H) -> (H, O)
    breg = u(keys[9], (O,)).reshape(1, O)

    x = jax.random.normal(keys[10], (S, B, I), jnp.float32)

    y = lstm_reg_forward(x, wih0, whh0, b0, wih1, whh1, b1, wreg, breg)
    y = jax.block_until_ready(y)

    y_ref = lstm_reg_reference(x, wih0, whh0, b0, wih1, whh1, b1, wreg, breg)
    assert y.shape == (S, B, O)
    assert jnp.allclose(y, y_ref, atol=1e-5, rtol=1e-5), (
        f"max abs err {jnp.max(jnp.abs(y - y_ref))}")

    print("KERNEL_OK")
</pallas_src>

<mosaic_0001>
module attributes {stable_mosaic.version = 11 : i64} {
  func.func @kernel(%arg0: i32, %arg1: memref<16x4xf32, #tpu.memory_space<vmem>>, %arg2: memref<4x128xf32, #tpu.memory_space<vmem>>, %arg3: memref<32x128xf32, #tpu.memory_space<vmem>>, %arg4: memref<1x128xf32, #tpu.memory_space<vmem>>, %arg5: memref<64x128xf32, #tpu.memory_space<vmem>>, %arg6: memref<1x128xf32, #tpu.memory_space<vmem>>, %arg7: memref<32x1xf32, #tpu.memory_space<vmem>>, %arg8: memref<1x1xf32, #tpu.memory_space<vmem>>, %arg9: memref<16x1xf32, #tpu.memory_space<vmem>>, %arg10: memref<16x32xf32, #tpu.memory_space<vmem>>) attributes {dimension_semantics = [#tpu.dimension_semantics<arbitrary>], iteration_bounds = array<i64: 1>, scalar_prefetch = 0 : i64, scratch_operands = 1 : i64, tpu.core_type = #tpu.core_type<tc>, window_params = [{pipeline_mode = #tpu.pipeline_mode<synchronous>, transform_indices = @transform_0, window_bounds = array<i64: 16, 4>}, {pipeline_mode = #tpu.pipeline_mode<synchronous>, transform_indices = @transform_1, window_bounds = array<i64: 4, 128>}, {pipeline_mode = #tpu.pipeline_mode<synchronous>, transform_indices = @transform_2, window_bounds = array<i64: 32, 128>}, {pipeline_mode = #tpu.pipeline_mode<synchronous>, transform_indices = @transform_3, window_bounds = array<i64: 1, 128>}, {pipeline_mode = #tpu.pipeline_mode<synchronous>, transform_indices = @transform_4, window_bounds = array<i64: 64, 128>}, {pipeline_mode = #tpu.pipeline_mode<synchronous>, transform_indices = @transform_5, window_bounds = array<i64: 1, 128>}, {pipeline_mode = #tpu.pipeline_mode<synchronous>, transform_indices = @transform_6, window_bounds = array<i64: 32, 1>}, {pipeline_mode = #tpu.pipeline_mode<synchronous>, transform_indices = @transform_7, window_bounds = array<i64: 1, 1>}, {pipeline_mode = #tpu.pipeline_mode<synchronous>, transform_indices = @transform_8, window_bounds = array<i64: 16, 1>}]} {
    %c0 = arith.constant 0 : index
    %c0_0 = arith.constant 0 : index
    %0 = vector.load %arg1[%c0, %c0_0] : memref<16x4xf32, #tpu.memory_space<vmem>>, vector<16x4xf32>
    %c0_1 = arith.constant 0 : index
    %c0_2 = arith.constant 0 : index
    %1 = vector.load %arg2[%c0_1, %c0_2] : memref<4x128xf32, #tpu.memory_space<vmem>>, vector<4x128xf32>
    %cst = arith.constant dense<0.000000e+00> : vector<16x128xf32>
    %2 = tpu.matmul %0, %1, %cst {dimension_numbers = #tpu.dot_dimension_numbers<[1], [0], [0], [1], [0, 0, 1, 1], [], []>} : vector<16x4xf32>, vector<4x128xf32>, vector<16x128xf32> -> vector<16x128xf32>
    %c0_3 = arith.constant 0 : index
    %c0_4 = arith.constant 0 : index
    %3 = vector.load %arg4[%c0_3, %c0_4] : memref<1x128xf32, #tpu.memory_space<vmem>>, vector<1x128xf32>
    %4 = vector.broadcast %3 : vector<1x128xf32> to vector<16x128xf32>
    %5 = arith.addf %2, %4 : vector<16x128xf32>
    %c0_5 = arith.constant 0 : index
    %c0_6 = arith.constant 0 : index
    %6 = vector.load %arg3[%c0_5, %c0_6] : memref<32x128xf32, #tpu.memory_space<vmem>>, vector<32x128xf32>
    %c0_7 = arith.constant 0 : index
    %c0_8 = arith.constant 0 : index
    %7 = vector.load %arg5[%c0_7, %c0_8] : memref<64x128xf32, #tpu.memory_space<vmem>>, vector<64x128xf32>
    %c0_9 = arith.constant 0 : index
    %c0_10 = arith.constant 0 : index
    %8 = vector.load %arg6[%c0_9, %c0_10] : memref<1x128xf32, #tpu.memory_space<vmem>>, vector<1x128xf32>
    %9 = vector.shape_cast %8 : vector<1x128xf32> to vector<1x128xf32>
    %10 = vector.broadcast %9 : vector<1x128xf32> to vector<2x128xf32>
    %cst_11 = arith.constant 0.000000e+00 : f32
    %11 = vector.broadcast %cst_11 : f32 to vector<2x32xf32>
    %12 = vector.extract_strided_slice %5 {offsets = [0, 0], sizes = [2, 128], strides = [1, 1]} : vector<16x128xf32> to vector<2x128xf32>
    %cst_12 = arith.constant dense<0.000000e+00> : vector<2x128xf32>
    %13 = tpu.matmul %11, %6, %cst_12 {dimension_numbers = #tpu.dot_dimension_numbers<[1], [0], [0], [1], [0, 0, 1, 1], [], []>} : vector<2x32xf32>, vector<32x128xf32>, vector<2x128xf32> -> vector<2x128xf32>
    %14 = arith.addf %12, %13 : vector<2x128xf32>
    %15 = vector.extract_strided_slice %14 {offsets = [0, 0], sizes = [2, 32], strides = [1, 1]} : vector<2x128xf32> to vector<2x32xf32>
    %16 = arith.negf %15 : vector<2x32xf32>
    %17 = math.exp %16 : vector<2x32xf32>
    %cst_13 = arith.constant 1.000000e+00 : f32
    %18 = vector.broadcast %cst_13 : f32 to vector<2x32xf32>
    %19 = arith.addf %18, %17 : vector<2x32xf32>
    %20 = arith.divf %18, %19 : vector<2x32xf32>
    %21 = vector.extract_strided_slice %14 {offsets = [0, 32], sizes = [2, 32], strides = [1, 1]} : vector<2x128xf32> to vector<2x32xf32>
    %22 = arith.negf %21 : vector<2x32xf32>
    %23 = math.exp %22 : vector<2x32xf32>
    %cst_14 = arith.constant 1.000000e+00 : f32
    %24 = vector.broadcast %cst_14 : f32 to vector<2x32xf32>
    %25 = arith.addf %24, %23 : vector<2x32xf32>
    %26 = arith.divf %24, %25 : vector<2x32xf32>
    %27 = vector.extract_strided_slice %14 {offsets = [0, 64], sizes = [2, 32], strides = [1, 1]} : vector<2x128xf32> to vector<2x32xf32>
    %28 = math.tanh %27 : vector<2x32xf32>
    %29 = vector.extract_strided_slice %14 {offsets = [0, 96], sizes = [2, 32], strides = [1, 1]} : vector<2x128xf32> to vector<2x32xf32>
    %30 = arith.negf %29 : vector<2x32xf32>
    %31 = math.exp %30 : vector<2x32xf32>
    %cst_15 = arith.constant 1.000000e+00 : f32
    %32 = vector.broadcast %cst_15 : f32 to vector<2x32xf32>
    %33 = arith.addf %32, %31 : vector<2x32xf32>
    %34 = arith.divf %32, %33 : vector<2x32xf32>
    %35 = arith.mulf %26, %11 : vector<2x32xf32>
    %36 = arith.mulf %20, %28 : vector<2x32xf32>
    %37 = arith.addf %35, %36 : vector<2x32xf32>
    %38 = math.tanh %37 : vector<2x32xf32>
    %39 = arith.mulf %34, %38 : vector<2x32xf32>
    %40 = tpu.concatenate %39, %11 in 1 : vector<2x32xf32>, vector<2x32xf32> -> vector<2x64xf32>
    %cst_16 = arith.constant dense<0.000000e+00> : vector<2x128xf32>
    %41 = tpu.matmul %40, %7, %cst_16 {dimension_numbers = #tpu.dot_dimension_numbers<[1], [0], [0], [1], [0, 0, 1, 1], [], []>} : vector<2x64xf32>, vector<64x128xf32>, vector<2x128xf32> -> vector<2x128xf32>
    %42 = arith.addf %41, %10 : vector<2x128xf32>
    %43 = vector.extract_strided_slice %42 {offsets = [0, 0], sizes = [2, 32], strides = [1, 1]} : vector<2x128xf32> to vector<2x32xf32>
    %44 = arith.negf %43 : vector<2x32xf32>
    %45 = math.exp %44 : vector<2x32xf32>
    %cst_17 = arith.constant 1.000000e+00 : f32
    %46 = vector.broadcast %cst_17 : f32 to vector<2x32xf32>
    %47 = arith.addf %46, %45 : vector<2x32xf32>
    %48 = arith.divf %46, %47 : vector<2x32xf32>
    %49 = vector.extract_strided_slice %42 {offsets = [0, 32], sizes = [2, 32], strides = [1, 1]} : vector<2x128xf32> to vector<2x32xf32>
    %50 = arith.negf %49 : vector<2x32xf32>
    %51 = math.exp %50 : vector<2x32xf32>
    %cst_18 = arith.constant 1.000000e+00 : f32
    %52 = vector.broadcast %cst_18 : f32 to vector<2x32xf32>
    %53 = arith.addf %52, %51 : vector<2x32xf32>
    %54 = arith.divf %52, %53 : vector<2x32xf32>
    %55 = vector.extract_strided_slice %42 {offsets = [0, 64], sizes = [2, 32], strides = [1, 1]} : vector<2x128xf32> to vector<2x32xf32>
    %56 = math.tanh %55 : vector<2x32xf32>
    %57 = vector.extract_strided_slice %42 {offsets = [0, 96], sizes = [2, 32], strides = [1, 1]} : vector<2x128xf32> to vector<2x32xf32>
    %58 = arith.negf %57 : vector<2x32xf32>
    %59 = math.exp %58 : vector<2x32xf32>
    %cst_19 = arith.constant 1.000000e+00 : f32
    %60 = vector.broadcast %cst_19 : f32 to vector<2x32xf32>
    %61 = arith.addf %60, %59 : vector<2x32xf32>
    %62 = arith.divf %60, %61 : vector<2x32xf32>
    %63 = arith.mulf %54, %11 : vector<2x32xf32>
    %64 = arith.mulf %48, %56 : vector<2x32xf32>
    %65 = arith.addf %63, %64 : vector<2x32xf32>
    %66 = math.tanh %65 : vector<2x32xf32>
    %67 = arith.mulf %62, %66 : vector<2x32xf32>
    %c0_20 = arith.constant 0 : index
    %c0_21 = arith.constant 0 : index
    %68 = vector.load %arg10[%c0_20, %c0_21] : memref<16x32xf32, #tpu.memory_space<vmem>>, vector<2x32xf32>
    tpu.vector_store %arg10[%c0_20, %c0_21], %67 {strides = array<i32>} : memref<16x32xf32, #tpu.memory_space<vmem>>, vector<2x32xf32>,
    %69 = vector.extract_strided_slice %5 {offsets = [2, 0], sizes = [2, 128], strides = [1, 1]} : vector<16x128xf32> to vector<2x128xf32>
    %cst_22 = arith.constant dense<0.000000e+00> : vector<2x128xf32>
    %70 = tpu.matmul %39, %6, %cst_22 {dimension_numbers = #tpu.dot_dimension_numbers<[1], [0], [0], [1], [0, 0, 1, 1], [], []>} : vector<2x32xf32>, vector<32x128xf32>, vector<2x128xf32> -> vector<2x128xf32>
    %71 = arith.addf %69, %70 : vector<2x128xf32>
    %72 = vector.extract_strided_slice %71 {offsets = [0, 0], sizes = [2, 32], strides = [1, 1]} : vector<2x128xf32> to vector<2x32xf32>
    %73 = arith.negf %72 : vector<2x32xf32>
    %74 = math.exp %73 : vector<2x32xf32>
    %cst_23 = arith.constant 1.000000e+00 : f32
    %75 = vector.broadcast %cst_23 : f32 to vector<2x32xf32>
    %76 = arith.addf %75, %74 : vector<2x32xf32>
    %77 = arith.divf %75, %76 : vector<2x32xf32>
    %78 = vector.extract_strided_slice %71 {offsets = [0, 32], sizes = [2, 32], strides = [1, 1]} : vector<2x128xf32> to vector<2x32xf32>
    %79 = arith.negf %78 : vector<2x32xf32>
    %80 = math.exp %79 : vector<2x32xf32>
    %cst_24 = arith.constant 1.000000e+00 : f32
    %81 = vector.broadcast %cst_24 : f32 to vector<2x32xf32>
    %82 = arith.addf %81, %80 : vector<2x32xf32>
    %83 = arith.divf %81, %82 : vector<2x32xf32>
    %84 = vector.extract_strided_slice %71 {offsets = [0, 64], sizes = [2, 32], strides = [1, 1]} : vector<2x128xf32> to vector<2x32xf32>
    %85 = math.tanh %84 : vector<2x32xf32>
    %86 = vector.extract_strided_slice %71 {offsets = [0, 96], sizes = [2, 32], strides = [1, 1]} : vector<2x128xf32> to vector<2x32xf32>
    %87 = arith.negf %86 : vector<2x32xf32>
    %88 = math.exp %87 : vector<2x32xf32>
    %cst_25 = arith.constant 1.000000e+00 : f32
    %89 = vector.broadcast %cst_25 : f32 to vector<2x32xf32>
    %90 = arith.addf %89, %88 : vector<2x32xf32>
    %91 = arith.divf %89, %90 : vector<2x32xf32>
    %92 = arith.mulf %83, %37 : vector<2x32xf32>
    %93 = arith.mulf %77, %85 : vector<2x32xf32>
    %94 = arith.addf %92, %93 : vector<2x32xf32>
    %95 = math.tanh %94 : vector<2x32xf32>
    %96 = arith.mulf %91, %95 : vector<2x32xf32>
    %97 = tpu.concatenate %96, %67 in 1 : vector<2x32xf32>, vector<2x32xf32> -> vector<2x64xf32>
    %cst_26 = arith.constant dense<0.000000e+00> : vector<2x128xf32>
    %98 = tpu.matmul %97, %7, %cst_26 {dimension_numbers = #tpu.dot_dimension_numbers<[1], [0], [0], [1], [0, 0, 1, 1], [], []>} : vector<2x64xf32>, vector<64x128xf32>, vector<2x128xf32> -> vector<2x128xf32>
    %99 = arith.addf %98, %10 : vector<2x128xf32>
    %100 = vector.extract_strided_slice %99 {offsets = [0, 0], sizes = [2, 32], strides = [1, 1]} : vector<2x128xf32> to vector<2x32xf32>
    %101 = arith.negf %100 : vector<2x32xf32>
    %102 = math.exp %101 : vector<2x32xf32>
    %cst_27 = arith.constant 1.000000e+00 : f32
    %103 = vector.broadcast %cst_27 : f32 to vector<2x32xf32>
    %104 = arith.addf %103, %102 : vector<2x32xf32>
    %105 = arith.divf %103, %104 : vector<2x32xf32>
    %106 = vector.extract_strided_slice %99 {offsets = [0, 32], sizes = [2, 32], strides = [1, 1]} : vector<2x128xf32> to vector<2x32xf32>
    %107 = arith.negf %106 : vector<2x32xf32>
    %108 = math.exp %107 : vector<2x32xf32>
    %cst_28 = arith.constant 1.000000e+00 : f32
    %109 = vector.broadcast %cst_28 : f32 to vector<2x32xf32>
    %110 = arith.addf %109, %108 : vector<2x32xf32>
    %111 = arith.divf %109, %110 : vector<2x32xf32>
    %112 = vector.extract_strided_slice %99 {offsets = [0, 64], sizes = [2, 32], strides = [1, 1]} : vector<2x128xf32> to vector<2x32xf32>
    %113 = math.tanh %112 : vector<2x32xf32>
    %114 = vector.extract_strided_slice %99 {offsets = [0, 96], sizes = [2, 32], strides = [1, 1]} : vector<2x128xf32> to vector<2x32xf32>
    %115 = arith.negf %114 : vector<2x32xf32>
    %116 = math.exp %115 : vector<2x32xf32>
    %cst_29 = arith.constant 1.000000e+00 : f32
    %117 = vector.broadcast %cst_29 : f32 to vector<2x32xf32>
    %118 = arith.addf %117, %116 : vector<2x32xf32>
    %119 = arith.divf %117, %118 : vector<2x32xf32>
    %120 = arith.mulf %111, %65 : vector<2x32xf32>
    %121 = arith.mulf %105, %113 : vector<2x32xf32>
    %122 = arith.addf %120, %121 : vector<2x32xf32>
    %123 = math.tanh %122 : vector<2x32xf32>
    %124 = arith.mulf %119, %123 : vector<2x32xf32>
    %c2 = arith.constant 2 : index
    %c0_30 = arith.constant 0 : index
    %125 = vector.load %arg10[%c2, %c0_30] : memref<16x32xf32, #tpu.memory_space<vmem>>, vector<2x32xf32>
    tpu.vector_store %arg10[%c2, %c0_30], %124 {strides = array<i32>} : memref<16x32xf32, #tpu.memory_space<vmem>>, vector<2x32xf32>,
    %126 = vector.extract_strided_slice %5 {offsets = [4, 0], sizes = [2, 128], strides = [1, 1]} : vector<16x128xf32> to vector<2x128xf32>
    %cst_31 = arith.constant dense<0.000000e+00> : vector<2x128xf32>
    %127 = tpu.matmul %96, %6, %cst_31 {dimension_numbers = #tpu.dot_dimension_numbers<[1], [0], [0], [1], [0, 0, 1, 1], [], []>} : vector<2x32xf32>, vector<32x128xf32>, vector<2x128xf32> -> vector<2x128xf32>
    %128 = arith.addf %126, %127 : vector<2x128xf32>
    %129 = vector.extract_strided_slice %128 {offsets = [0, 0], sizes = [2, 32], strides = [1, 1]} : vector<2x128xf32> to vector<2x32xf32>
    %130 = arith.negf %129 : vector<2x32xf32>
    %131 = math.exp %130 : vector<2x32xf32>
    %cst_32 = arith.constant 1.000000e+00 : f32
    %132 = vector.broadcast %cst_32 : f32 to vector<2x32xf32>
    %133 = arith.addf %132, %131 : vector<2x32xf32>
    %134 = arith.divf %132, %133 : vector<2x32xf32>
    %135 = vector.extract_strided_slice %128 {offsets = [0, 32], sizes = [2, 32], strides = [1, 1]} : vector<2x128xf32> to vector<2x32xf32>
    %136 = arith.negf %135 : vector<2x32xf32>
    %137 = math.exp %136 : vector<2x32xf32>
    %cst_33 = arith.constant 1.000000e+00 : f32
    %138 = vector.broadcast %cst_33 : f32 to vector<2x32xf32>
    %139 = arith.addf %138, %137 : vector<2x32xf32>
    %140 = arith.divf %138, %139 : vector<2x32xf32>
    %141 = vector.extract_strided_slice %128 {offsets = [0, 64], sizes = [2, 32], strides = [1, 1]} : vector<2x128xf32> to vector<2x32xf32>
    %142 = math.tanh %141 : vector<2x32xf32>
    %143 = vector.extract_strided_slice %128 {offsets = [0, 96], sizes = [2, 32], strides = [1, 1]} : vector<2x128xf32> to vector<2x32xf32>
    %144 = arith.negf %143 : vector<2x32xf32>
    %145 = math.exp %144 : vector<2x32xf32>
    %cst_34 = arith.constant 1.000000e+00 : f32
    %146 = vector.broadcast %cst_34 : f32 to vector<2x32xf32>
    %147 = arith.addf %146, %145 : vector<2x32xf32>
    %148 = arith.divf %146, %147 : vector<2x32xf32>
    %149 = arith.mulf %140, %94 : vector<2x32xf32>
    %150 = arith.mulf %134, %142 : vector<2x32xf32>
    %151 = arith.addf %149, %150 : vector<2x32xf32>
    %152 = math.tanh %151 : vector<2x32xf32>
    %153 = arith.mulf %148, %152 : vector<2x32xf32>
    %154 = tpu.concatenate %153, %124 in 1 : vector<2x32xf32>, vector<2x32xf32> -> vector<2x64xf32>
    %cst_35 = arith.constant dense<0.000000e+00> : vector<2x128xf32>
    %155 = tpu.matmul %154, %7, %cst_35 {dimension_numbers = #tpu.dot_dimension_numbers<[1], [0], [0], [1], [0, 0, 1, 1], [], []>} : vector<2x64xf32>, vector<64x128xf32>, vector<2x128xf32> -> vector<2x128xf32>
    %156 = arith.addf %155, %10 : vector<2x128xf32>
    %157 = vector.extract_strided_slice %156 {offsets = [0, 0], sizes = [2, 32], strides = [1, 1]} : vector<2x128xf32> to vector<2x32xf32>
    %158 = arith.negf %157 : vector<2x32xf32>
    %159 = math.exp %158 : vector<2x32xf32>
    %cst_36 = arith.constant 1.000000e+00 : f32
    %160 = vector.broadcast %cst_36 : f32 to vector<2x32xf32>
    %161 = arith.addf %160, %159 : vector<2x32xf32>
    %162 = arith.divf %160, %161 : vector<2x32xf32>
    %163 = vector.extract_strided_slice %156 {offsets = [0, 32], sizes = [2, 32], strides = [1, 1]} : vector<2x128xf32> to vector<2x32xf32>
    %164 = arith.negf %163 : vector<2x32xf32>
    %165 = math.exp %164 : vector<2x32xf32>
    %cst_37 = arith.constant 1.000000e+00 : f32
    %166 = vector.broadcast %cst_37 : f32 to vector<2x32xf32>
    %167 = arith.addf %166, %165 : vector<2x32xf32>
    %168 = arith.divf %166, %167 : vector<2x32xf32>
    %169 = vector.extract_strided_slice %156 {offsets = [0, 64], sizes = [2, 32], strides = [1, 1]} : vector<2x128xf32> to vector<2x32xf32>
    %170 = math.tanh %169 : vector<2x32xf32>
    %171 = vector.extract_strided_slice %156 {offsets = [0, 96], sizes = [2, 32], strides = [1, 1]} : vector<2x128xf32> to vector<2x32xf32>
    %172 = arith.negf %171 : vector<2x32xf32>
    %173 = math.exp %172 : vector<2x32xf32>
    %cst_38 = arith.constant 1.000000e+00 : f32
    %174 = vector.broadcast %cst_38 : f32 to vector<2x32xf32>
    %175 = arith.addf %174, %173 : vector<2x32xf32>
    %176 = arith.divf %174, %175 : vector<2x32xf32>
    %177 = arith.mulf %168, %122 : vector<2x32xf32>
    %178 = arith.mulf %162, %170 : vector<2x32xf32>
    %179 = arith.addf %177, %178 : vector<2x32xf32>
    %180 = math.tanh %179 : vector<2x32xf32>
    %181 = arith.mulf %176, %180 : vector<2x32xf32>
    %c4 = arith.constant 4 : index
    %c0_39 = arith.constant 0 : index
    %182 = vector.load %arg10[%c4, %c0_39] : memref<16x32xf32, #tpu.memory_space<vmem>>, vector<2x32xf32>
    tpu.vector_store %arg10[%c4, %c0_39], %181 {strides = array<i32>} : memref<16x32xf32, #tpu.memory_space<vmem>>, vector<2x32xf32>,
    %183 = vector.extract_strided_slice %5 {offsets = [6, 0], sizes = [2, 128], strides = [1, 1]} : vector<16x128xf32> to vector<2x128xf32>
    %cst_40 = arith.constant dense<0.000000e+00> : vector<2x128xf32>
    %184 = tpu.matmul %153, %6, %cst_40 {dimension_numbers = #tpu.dot_dimension_numbers<[1], [0], [0], [1], [0, 0, 1, 1], [], []>} : vector<2x32xf32>, vector<32x128xf32>, vector<2x128xf32> -> vector<2x128xf32>
    %185 = arith.addf %183, %184 : vector<2x128xf32>
    %186 = vector.extract_strided_slice %185 {offsets = [0, 0], sizes = [2, 32], strides = [1, 1]} : vector<2x128xf32> to vector<2x32xf32>
    %187 = arith.negf %186 : vector<2x32xf32>
    %188 = math.exp %187 : vector<2x32xf32>
    %cst_41 = arith.constant 1.000000e+00 : f32
    %189 = vector.broadcast %cst_41 : f32 to vector<2x32xf32>
    %190 = arith.addf %189, %188 : vector<2x32xf32>
    %191 = arith.divf %189, %190 : vector<2x32xf32>
    %192 = vector.extract_strided_slice %185 {offsets = [0, 32], sizes = [2, 32], strides = [1, 1]} : vector<2x128xf32> to vector<2x32xf32>
    %193 = arith.negf %192 : vector<2x32xf32>
    %194 = math.exp %193 : vector<2x32xf32>
    %cst_42 = arith.constant 1.000000e+00 : f32
    %195 = vector.broadcast %cst_42 : f32 to vector<2x32xf32>
    %196 = arith.addf %195, %194 : vector<2x32xf32>
    %197 = arith.divf %195, %196 : vector<2x32xf32>
    %198 = vector.extract_strided_slice %185 {offsets = [0, 64], sizes = [2, 32], strides = [1, 1]} : vector<2x128xf32> to vector<2x32xf32>
    %199 = math.tanh %198 : vector<2x32xf32>
    %200 = vector.extract_strided_slice %185 {offsets = [0, 96], sizes = [2, 32], strides = [1, 1]} : vector<2x128xf32> to vector<2x32xf32>
    %201 = arith.negf %200 : vector<2x32xf32>
    %202 = math.exp %201 : vector<2x32xf32>
    %cst_43 = arith.constant 1.000000e+00 : f32
    %203 = vector.broadcast %cst_43 : f32 to vector<2x32xf32>
    %204 = arith.addf %203, %202 : vector<2x32xf32>
    %205 = arith.divf %203, %204 : vector<2x32xf32>
    %206 = arith.mulf %197, %151 : vector<2x32xf32>
    %207 = arith.mulf %191, %199 : vector<2x32xf32>
    %208 = arith.addf %206, %207 : vector<2x32xf32>
    %209 = math.tanh %208 : vector<2x32xf32>
    %210 = arith.mulf %205, %209 : vector<2x32xf32>
    %211 = tpu.concatenate %210, %181 in 1 : vector<2x32xf32>, vector<2x32xf32> -> vector<2x64xf32>
    %cst_44 = arith.constant dense<0.000000e+00> : vector<2x128xf32>
    %212 = tpu.matmul %211, %7, %cst_44 {dimension_numbers = #tpu.dot_dimension_numbers<[1], [0], [0], [1], [0, 0, 1, 1], [], []>} : vector<2x64xf32>, vector<64x128xf32>, vector<2x128xf32> -> vector<2x128xf32>
    %213 = arith.addf %212, %10 : vector<2x128xf32>
    %214 = vector.extract_strided_slice %213 {offsets = [0, 0], sizes = [2, 32], strides = [1, 1]} : vector<2x128xf32> to vector<2x32xf32>
    %215 = arith.negf %214 : vector<2x32xf32>
    %216 = math.exp %215 : vector<2x32xf32>
    %cst_45 = arith.constant 1.000000e+00 : f32
    %217 = vector.broadcast %cst_45 : f32 to vector<2x32xf32>
    %218 = arith.addf %217, %216 : vector<2x32xf32>
    %219 = arith.divf %217, %218 : vector<2x32xf32>
    %220 = vector.extract_strided_slice %213 {offsets = [0, 32], sizes = [2, 32], strides = [1, 1]} : vector<2x128xf32> to vector<2x32xf32>
    %221 = arith.negf %220 : vector<2x32xf32>
    %222 = math.exp %221 : vector<2x32xf32>
    %cst_46 = arith.constant 1.000000e+00 : f32
    %223 = vector.broadcast %cst_46 : f32 to vector<2x32xf32>
    %224 = arith.addf %223, %222 : vector<2x32xf32>
    %225 = arith.divf %223, %224 : vector<2x32xf32>
    %226 = vector.extract_strided_slice %213 {offsets = [0, 64], sizes = [2, 32], strides = [1, 1]} : vector<2x128xf32> to vector<2x32xf32>
    %227 = math.tanh %226 : vector<2x32xf32>
    %228 = vector.extract_strided_slice %213 {offsets = [0, 96], sizes = [2, 32], strides = [1, 1]} : vector<2x128xf32> to vector<2x32xf32>
    %229 = arith.negf %228 : vector<2x32xf32>
    %230 = math.exp %229 : vector<2x32xf32>
    %cst_47 = arith.constant 1.000000e+00 : f32
    %231 = vector.broadcast %cst_47 : f32 to vector<2x32xf32>
    %232 = arith.addf %231, %230 : vector<2x32xf32>
    %233 = arith.divf %231, %232 : vector<2x32xf32>
    %234 = arith.mulf %225, %179 : vector<2x32xf32>
    %235 = arith.mulf %219, %227 : vector<2x32xf32>
    %236 = arith.addf %234, %235 : vector<2x32xf32>
    %237 = math.tanh %236 : vector<2x32xf32>
    %238 = arith.mulf %233, %237 : vector<2x32xf32>
    %c6 = arith.constant 6 : index
    %c0_48 = arith.constant 0 : index
    %239 = vector.load %arg10[%c6, %c0_48] : memref<16x32xf32, #tpu.memory_space<vmem>>, vector<2x32xf32>
    tpu.vector_store %arg10[%c6, %c0_48], %238 {strides = array<i32>} : memref<16x32xf32, #tpu.memory_space<vmem>>, vector<2x32xf32>,
    %240 = vector.extract_strided_slice %5 {offsets = [8, 0], sizes = [2, 128], strides = [1, 1]} : vector<16x128xf32> to vector<2x128xf32>
    %cst_49 = arith.constant dense<0.000000e+00> : vector<2x128xf32>
    %241 = tpu.matmul %210, %6, %cst_49 {dimension_numbers = #tpu.dot_dimension_numbers<[1], [0], [0], [1], [0, 0, 1, 1], [], []>} : vector<2x32xf32>, vector<32x128xf32>, vector<2x128xf32> -> vector<2x128xf32>
    %242 = arith.addf %240, %241 : vector<2x128xf32>
    %243 = vector.extract_strided_slice %242 {offsets = [0, 0], sizes = [2, 32], strides = [1, 1]} : vector<2x128xf32> to vector<2x32xf32>
    %244 = arith.negf %243 : vector<2x32xf32>
    %245 = math.exp %244 : vector<2x32xf32>
    %cst_50 = arith.constant 1.000000e+00 : f32
    %246 = vector.broadcast %cst_50 : f32 to vector<2x32xf32>
    %247 = arith.addf %246, %245 : vector<2x32xf32>
    %248 = arith.divf %246, %247 : vector<2x32xf32>
    %249 = vector.extract_strided_slice %242 {offsets = [0, 32], sizes = [2, 32], strides = [1, 1]} : vector<2x128xf32> to vector<2x32xf32>
    %250 = arith.negf %249 : vector<2x32xf32>
    %251 = math.exp %250 : vector<2x32xf32>
    %cst_51 = arith.constant 1.000000e+00 : f32
    %252 = vector.broadcast %cst_51 : f32 to vector<2x32xf32>
    %253 = arith.addf %252, %251 : vector<2x32xf32>
    %254 = arith.divf %252, %253 : vector<2x32xf32>
    %255 = vector.extract_strided_slice %242 {offsets = [0, 64], sizes = [2, 32], strides = [1, 1]} : vector<2x128xf32> to vector<2x32xf32>
    %256 = math.tanh %255 : vector<2x32xf32>
    %257 = vector.extract_strided_slice %242 {offsets = [0, 96], sizes = [2, 32], strides = [1, 1]} : vector<2x128xf32> to vector<2x32xf32>
    %258 = arith.negf %257 : vector<2x32xf32>
    %259 = math.exp %258 : vector<2x32xf32>
    %cst_52 = arith.constant 1.000000e+00 : f32
    %260 = vector.broadcast %cst_52 : f32 to vector<2x32xf32>
    %261 = arith.addf %260, %259 : vector<2x32xf32>
    %262 = arith.divf %260, %261 : vector<2x32xf32>
    %263 = arith.mulf %254, %208 : vector<2x32xf32>
    %264 = arith.mulf %248, %256 : vector<2x32xf32>
    %265 = arith.addf %263, %264 : vector<2x32xf32>
    %266 = math.tanh %265 : vector<2x32xf32>
    %267 = arith.mulf %262, %266 : vector<2x32xf32>
    %268 = tpu.concatenate %267, %238 in 1 : vector<2x32xf32>, vector<2x32xf32> -> vector<2x64xf32>
    %cst_53 = arith.constant dense<0.000000e+00> : vector<2x128xf32>
    %269 = tpu.matmul %268, %7, %cst_53 {dimension_numbers = #tpu.dot_dimension_numbers<[1], [0], [0], [1], [0, 0, 1, 1], [], []>} : vector<2x64xf32>, vector<64x128xf32>, vector<2x128xf32> -> vector<2x128xf32>
    %270 = arith.addf %269, %10 : vector<2x128xf32>
    %271 = vector.extract_strided_slice %270 {offsets = [0, 0], sizes = [2, 32], strides = [1, 1]} : vector<2x128xf32> to vector<2x32xf32>
    %272 = arith.negf %271 : vector<2x32xf32>
    %273 = math.exp %272 : vector<2x32xf32>
    %cst_54 = arith.constant 1.000000e+00 : f32
    %274 = vector.broadcast %cst_54 : f32 to vector<2x32xf32>
    %275 = arith.addf %274, %273 : vector<2x32xf32>
    %276 = arith.divf %274, %275 : vector<2x32xf32>
    %277 = vector.extract_strided_slice %270 {offsets = [0, 32], sizes = [2, 32], strides = [1, 1]} : vector<2x128xf32> to vector<2x32xf32>
    %278 = arith.negf %277 : vector<2x32xf32>
    %279 = math.exp %278 : vector<2x32xf32>
    %cst_55 = arith.constant 1.000000e+00 : f32
    %280 = vector.broadcast %cst_55 : f32 to vector<2x32xf32>
    %281 = arith.addf %280, %279 : vector<2x32xf32>
    %282 = arith.divf %280, %281 : vector<2x32xf32>
    %283 = vector.extract_strided_slice %270 {offsets = [0, 64], sizes = [2, 32], strides = [1, 1]} : vector<2x128xf32> to vector<2x32xf32>
    %284 = math.tanh %283 : vector<2x32xf32>
    %285 = vector.extract_strided_slice %270 {offsets = [0, 96], sizes = [2, 32], strides = [1, 1]} : vector<2x128xf32> to vector<2x32xf32>
    %286 = arith.negf %285 : vector<2x32xf32>
    %287 = math.exp %286 : vector<2x32xf32>
    %cst_56 = arith.constant 1.000000e+00 : f32
    %288 = vector.broadcast %cst_56 : f32 to vector<2x32xf32>
    %289 = arith.addf %288, %287 : vector<2x32xf32>
    %290 = arith.divf %288, %289 : vector<2x32xf32>
    %291 = arith.mulf %282, %236 : vector<2x32xf32>
    %292 = arith.mulf %276, %284 : vector<2x32xf32>
    %293 = arith.addf %291, %292 : vector<2x32xf32>
    %294 = math.tanh %293 : vector<2x32xf32>
    %295 = arith.mulf %290, %294 : vector<2x32xf32>
    %c8 = arith.constant 8 : index
    %c0_57 = arith.constant 0 : index
    %296 = vector.load %arg10[%c8, %c0_57] : memref<16x32xf32, #tpu.memory_space<vmem>>, vector<2x32xf32>
    tpu.vector_store %arg10[%c8, %c0_57], %295 {strides = array<i32>} : memref<16x32xf32, #tpu.memory_space<vmem>>, vector<2x32xf32>,
    %297 = vector.extract_strided_slice %5 {offsets = [10, 0], sizes = [2, 128], strides = [1, 1]} : vector<16x128xf32> to vector<2x128xf32>
    %cst_58 = arith.constant dense<0.000000e+00> : vector<2x128xf32>
    %298 = tpu.matmul %267, %6, %cst_58 {dimension_numbers = #tpu.dot_dimension_numbers<[1], [0], [0], [1], [0, 0, 1, 1], [], []>} : vector<2x32xf32>, vector<32x128xf32>, vector<2x128xf32> -> vector<2x128xf32>
    %299 = arith.addf %297, %298 : vector<2x128xf32>
    %300 = vector.extract_strided_slice %299 {offsets = [0, 0], sizes = [2, 32], strides = [1, 1]} : vector<2x128xf32> to vector<2x32xf32>
    %301 = arith.negf %300 : vector<2x32xf32>
    %302 = math.exp %301 : vector<2x32xf32>
    %cst_59 = arith.constant 1.000000e+00 : f32
    %303 = vector.broadcast %cst_59 : f32 to vector<2x32xf32>
    %304 = arith.addf %303, %302 : vector<2x32xf32>
    %305 = arith.divf %303, %304 : vector<2x32xf32>
    %306 = vector.extract_strided_slice %299 {offsets = [0, 32], sizes = [2, 32], strides = [1, 1]} : vector<2x128xf32> to vector<2x32xf32>
    %307 = arith.negf %306 : vector<2x32xf32>
    %308 = math.exp %307 : vector<2x32xf32>
    %cst_60 = arith.constant 1.000000e+00 : f32
    %309 = vector.broadcast %cst_60 : f32 to vector<2x32xf32>
    %310 = arith.addf %309, %308 : vector<2x32xf32>
    %311 = arith.divf %309, %310 : vector<2x32xf32>
    %312 = vector.extract_strided_slice %299 {offsets = [0, 64], sizes = [2, 32], strides = [1, 1]} : vector<2x128xf32> to vector<2x32xf32>
    %313 = math.tanh %312 : vector<2x32xf32>
    %314 = vector.extract_strided_slice %299 {offsets = [0, 96], sizes = [2, 32], strides = [1, 1]} : vector<2x128xf32> to vector<2x32xf32>
    %315 = arith.negf %314 : vector<2x32xf32>
    %316 = math.exp %315 : vector<2x32xf32>
    %cst_61 = arith.constant 1.000000e+00 : f32
    %317 = vector.broadcast %cst_61 : f32 to vector<2x32xf32>
    %318 = arith.addf %317, %316 : vector<2x32xf32>
    %319 = arith.divf %317, %318 : vector<2x32xf32>
    %320 = arith.mulf %311, %265 : vector<2x32xf32>
    %321 = arith.mulf %305, %313 : vector<2x32xf32>
    %322 = arith.addf %320, %321 : vector<2x32xf32>
    %323 = math.tanh %322 : vector<2x32xf32>
    %324 = arith.mulf %319, %323 : vector<2x32xf32>
    %325 = tpu.concatenate %324, %295 in 1 : vector<2x32xf32>, vector<2x32xf32> -> vector<2x64xf32>
    %cst_62 = arith.constant dense<0.000000e+00> : vector<2x128xf32>
    %326 = tpu.matmul %325, %7, %cst_62 {dimension_numbers = #tpu.dot_dimension_numbers<[1], [0], [0], [1], [0, 0, 1, 1], [], []>} : vector<2x64xf32>, vector<64x128xf32>, vector<2x128xf32> -> vector<2x128xf32>
    %327 = arith.addf %326, %10 : vector<2x128xf32>
    %328 = vector.extract_strided_slice %327 {offsets = [0, 0], sizes = [2, 32], strides = [1, 1]} : vector<2x128xf32> to vector<2x32xf32>
    %329 = arith.negf %328 : vector<2x32xf32>
    %330 = math.exp %329 : vector<2x32xf32>
    %cst_63 = arith.constant 1.000000e+00 : f32
    %331 = vector.broadcast %cst_63 : f32 to vector<2x32xf32>
    %332 = arith.addf %331, %330 : vector<2x32xf32>
    %333 = arith.divf %331, %332 : vector<2x32xf32>
    %334 = vector.extract_strided_slice %327 {offsets = [0, 32], sizes = [2, 32], strides = [1, 1]} : vector<2x128xf32> to vector<2x32xf32>
    %335 = arith.negf %334 : vector<2x32xf32>
    %336 = math.exp %335 : vector<2x32xf32>
    %cst_64 = arith.constant 1.000000e+00 : f32
    %337 = vector.broadcast %cst_64 : f32 to vector<2x32xf32>
    %338 = arith.addf %337, %336 : vector<2x32xf32>
    %339 = arith.divf %337, %338 : vector<2x32xf32>
    %340 = vector.extract_strided_slice %327 {offsets = [0, 64], sizes = [2, 32], strides = [1, 1]} : vector<2x128xf32> to vector<2x32xf32>
    %341 = math.tanh %340 : vector<2x32xf32>
    %342 = vector.extract_strided_slice %327 {offsets = [0, 96], sizes = [2, 32], strides = [1, 1]} : vector<2x128xf32> to vector<2x32xf32>
    %343 = arith.negf %342 : vector<2x32xf32>
    %344 = math.exp %343 : vector<2x32xf32>
    %cst_65 = arith.constant 1.000000e+00 : f32
    %345 = vector.broadcast %cst_65 : f32 to vector<2x32xf32>
    %346 = arith.addf %345, %344 : vector<2x32xf32>
    %347 = arith.divf %345, %346 : vector<2x32xf32>
    %348 = arith.mulf %339, %293 : vector<2x32xf32>
    %349 = arith.mulf %333, %341 : vector<2x32xf32>
    %350 = arith.addf %348, %349 : vector<2x32xf32>
    %351 = math.tanh %350 : vector<2x32xf32>
    %352 = arith.mulf %347, %351 : vector<2x32xf32>
    %c10 = arith.constant 10 : index
    %c0_66 = arith.constant 0 : index
    %353 = vector.load %arg10[%c10, %c0_66] : memref<16x32xf32, #tpu.memory_space<vmem>>, vector<2x32xf32>
    tpu.vector_store %arg10[%c10, %c0_66], %352 {strides = array<i32>} : memref<16x32xf32, #tpu.memory_space<vmem>>, vector<2x32xf32>,
    %354 = vector.extract_strided_slice %5 {offsets = [12, 0], sizes = [2, 128], strides = [1, 1]} : vector<16x128xf32> to vector<2x128xf32>
    %cst_67 = arith.constant dense<0.000000e+00> : vector<2x128xf32>
    %355 = tpu.matmul %324, %6, %cst_67 {dimension_numbers = #tpu.dot_dimension_numbers<[1], [0], [0], [1], [0, 0, 1, 1], [], []>} : vector<2x32xf32>, vector<32x128xf32>, vector<2x128xf32> -> vector<2x128xf32>
    %356 = arith.addf %354, %355 : vector<2x128xf32>
    %357 = vector.extract_strided_slice %356 {offsets = [0, 0], sizes = [2, 32], strides = [1, 1]} : vector<2x128xf32> to vector<2x32xf32>
    %358 = arith.negf %357 : vector<2x32xf32>
    %359 = math.exp %358 : vector<2x32xf32>
    %cst_68 = arith.constant 1.000000e+00 : f32
    %360 = vector.broadcast %cst_68 : f32 to vector<2x32xf32>
    %361 = arith.addf %360, %359 : vector<2x32xf32>
    %362 = arith.divf %360, %361 : vector<2x32xf32>
    %363 = vector.extract_strided_slice %356 {offsets = [0, 32], sizes = [2, 32], strides = [1, 1]} : vector<2x128xf32> to vector<2x32xf32>
    %364 = arith.negf %363 : vector<2x32xf32>
    %365 = math.exp %364 : vector<2x32xf32>
    %cst_69 = arith.constant 1.000000e+00 : f32
    %366 = vector.broadcast %cst_69 : f32 to vector<2x32xf32>
    %367 = arith.addf %366, %365 : vector<2x32xf32>
    %368 = arith.divf %366, %367 : vector<2x32xf32>
    %369 = vector.extract_strided_slice %356 {offsets = [0, 64], sizes = [2, 32], strides = [1, 1]} : vector<2x128xf32> to vector<2x32xf32>
    %370 = math.tanh %369 : vector<2x32xf32>
    %371 = vector.extract_strided_slice %356 {offsets = [0, 96], sizes = [2, 32], strides = [1, 1]} : vector<2x128xf32> to vector<2x32xf32>
    %372 = arith.negf %371 : vector<2x32xf32>
    %373 = math.exp %372 : vector<2x32xf32>
    %cst_70 = arith.constant 1.000000e+00 : f32
    %374 = vector.broadcast %cst_70 : f32 to vector<2x32xf32>
    %375 = arith.addf %374, %373 : vector<2x32xf32>
    %376 = arith.divf %374, %375 : vector<2x32xf32>
    %377 = arith.mulf %368, %322 : vector<2x32xf32>
    %378 = arith.mulf %362, %370 : vector<2x32xf32>
    %379 = arith.addf %377, %378 : vector<2x32xf32>
    %380 = math.tanh %379 : vector<2x32xf32>
    %381 = arith.mulf %376, %380 : vector<2x32xf32>
    %382 = tpu.concatenate %381, %352 in 1 : vector<2x32xf32>, vector<2x32xf32> -> vector<2x64xf32>
    %cst_71 = arith.constant dense<0.000000e+00> : vector<2x128xf32>
    %383 = tpu.matmul %382, %7, %cst_71 {dimension_numbers = #tpu.dot_dimension_numbers<[1], [0], [0], [1], [0, 0, 1, 1], [], []>} : vector<2x64xf32>, vector<64x128xf32>, vector<2x128xf32> -> vector<2x128xf32>
    %384 = arith.addf %383, %10 : vector<2x128xf32>
    %385 = vector.extract_strided_slice %384 {offsets = [0, 0], sizes = [2, 32], strides = [1, 1]} : vector<2x128xf32> to vector<2x32xf32>
    %386 = arith.negf %385 : vector<2x32xf32>
    %387 = math.exp %386 : vector<2x32xf32>
    %cst_72 = arith.constant 1.000000e+00 : f32
    %388 = vector.broadcast %cst_72 : f32 to vector<2x32xf32>
    %389 = arith.addf %388, %387 : vector<2x32xf32>
    %390 = arith.divf %388, %389 : vector<2x32xf32>
    %391 = vector.extract_strided_slice %384 {offsets = [0, 32], sizes = [2, 32], strides = [1, 1]} : vector<2x128xf32> to vector<2x32xf32>
    %392 = arith.negf %391 : vector<2x32xf32>
    %393 = math.exp %392 : vector<2x32xf32>
    %cst_73 = arith.constant 1.000000e+00 : f32
    %394 = vector.broadcast %cst_73 : f32 to vector<2x32xf32>
    %395 = arith.addf %394, %393 : vector<2x32xf32>
    %396 = arith.divf %394, %395 : vector<2x32xf32>
    %397 = vector.extract_strided_slice %384 {offsets = [0, 64], sizes = [2, 32], strides = [1, 1]} : vector<2x128xf32> to vector<2x32xf32>
    %398 = math.tanh %397 : vector<2x32xf32>
    %399 = vector.extract_strided_slice %384 {offsets = [0, 96], sizes = [2, 32], strides = [1, 1]} : vector<2x128xf32> to vector<2x32xf32>
    %400 = arith.negf %399 : vector<2x32xf32>
    %401 = math.exp %400 : vector<2x32xf32>
    %cst_74 = arith.constant 1.000000e+00 : f32
    %402 = vector.broadcast %cst_74 : f32 to vector<2x32xf32>
    %403 = arith.addf %402, %401 : vector<2x32xf32>
    %404 = arith.divf %402, %403 : vector<2x32xf32>
    %405 = arith.mulf %396, %350 : vector<2x32xf32>
    %406 = arith.mulf %390, %398 : vector<2x32xf32>
    %407 = arith.addf %405, %406 : vector<2x32xf32>
    %408 = math.tanh %407 : vector<2x32xf32>
    %409 = arith.mulf %404, %408 : vector<2x32xf32>
    %c12 = arith.constant 12 : index
    %c0_75 = arith.constant 0 : index
    %410 = vector.load %arg10[%c12, %c0_75] : memref<16x32xf32, #tpu.memory_space<vmem>>, vector<2x32xf32>
    tpu.vector_store %arg10[%c12, %c0_75], %409 {strides = array<i32>} : memref<16x32xf32, #tpu.memory_space<vmem>>, vector<2x32xf32>,
    %411 = vector.extract_strided_slice %5 {offsets = [14, 0], sizes = [2, 128], strides = [1, 1]} : vector<16x128xf32> to vector<2x128xf32>
    %cst_76 = arith.constant dense<0.000000e+00> : vector<2x128xf32>
    %412 = tpu.matmul %381, %6, %cst_76 {dimension_numbers = #tpu.dot_dimension_numbers<[1], [0], [0], [1], [0, 0, 1, 1], [], []>} : vector<2x32xf32>, vector<32x128xf32>, vector<2x128xf32> -> vector<2x128xf32>
    %413 = arith.addf %411, %412 : vector<2x128xf32>
    %414 = vector.extract_strided_slice %413 {offsets = [0, 0], sizes = [2, 32], strides = [1, 1]} : vector<2x128xf32> to vector<2x32xf32>
    %415 = arith.negf %414 : vector<2x32xf32>
    %416 = math.exp %415 : vector<2x32xf32>
    %cst_77 = arith.constant 1.000000e+00 : f32
    %417 = vector.broadcast %cst_77 : f32 to vector<2x32xf32>
    %418 = arith.addf %417, %416 : vector<2x32xf32>
    %419 = arith.divf %417, %418 : vector<2x32xf32>
    %420 = vector.extract_strided_slice %413 {offsets = [0, 32], sizes = [2, 32], strides = [1, 1]} : vector<2x128xf32> to vector<2x32xf32>
    %421 = arith.negf %420 : vector<2x32xf32>
    %422 = math.exp %421 : vector<2x32xf32>
    %cst_78 = arith.constant 1.000000e+00 : f32
    %423 = vector.broadcast %cst_78 : f32 to vector<2x32xf32>
    %424 = arith.addf %423, %422 : vector<2x32xf32>
    %425 = arith.divf %423, %424 : vector<2x32xf32>
    %426 = vector.extract_strided_slice %413 {offsets = [0, 64], sizes = [2, 32], strides = [1, 1]} : vector<2x128xf32> to vector<2x32xf32>
    %427 = math.tanh %426 : vector<2x32xf32>
    %428 = vector.extract_strided_slice %413 {offsets = [0, 96], sizes = [2, 32], strides = [1, 1]} : vector<2x128xf32> to vector<2x32xf32>
    %429 = arith.negf %428 : vector<2x32xf32>
    %430 = math.exp %429 : vector<2x32xf32>
    %cst_79 = arith.constant 1.000000e+00 : f32
    %431 = vector.broadcast %cst_79 : f32 to vector<2x32xf32>
    %432 = arith.addf %431, %430 : vector<2x32xf32>
    %433 = arith.divf %431, %432 : vector<2x32xf32>
    %434 = arith.mulf %425, %379 : vector<2x32xf32>
    %435 = arith.mulf %419, %427 : vector<2x32xf32>
    %436 = arith.addf %434, %435 : vector<2x32xf32>
    %437 = math.tanh %436 : vector<2x32xf32>
    %438 = arith.mulf %433, %437 : vector<2x32xf32>
    %439 = tpu.concatenate %438, %409 in 1 : vector<2x32xf32>, vector<2x32xf32> -> vector<2x64xf32>
    %cst_80 = arith.constant dense<0.000000e+00> : vector<2x128xf32>
    %440 = tpu.matmul %439, %7, %cst_80 {dimension_numbers = #tpu.dot_dimension_numbers<[1], [0], [0], [1], [0, 0, 1, 1], [], []>} : vector<2x64xf32>, vector<64x128xf32>, vector<2x128xf32> -> vector<2x128xf32>
    %441 = arith.addf %440, %10 : vector<2x128xf32>
    %442 = vector.extract_strided_slice %441 {offsets = [0, 0], sizes = [2, 32], strides = [1, 1]} : vector<2x128xf32> to vector<2x32xf32>
    %443 = arith.negf %442 : vector<2x32xf32>
    %444 = math.exp %443 : vector<2x32xf32>
    %cst_81 = arith.constant 1.000000e+00 : f32
    %445 = vector.broadcast %cst_81 : f32 to vector<2x32xf32>
    %446 = arith.addf %445, %444 : vector<2x32xf32>
    %447 = arith.divf %445, %446 : vector<2x32xf32>
    %448 = vector.extract_strided_slice %441 {offsets = [0, 32], sizes = [2, 32], strides = [1, 1]} : vector<2x128xf32> to vector<2x32xf32>
    %449 = arith.negf %448 : vector<2x32xf32>
    %450 = math.exp %449 : vector<2x32xf32>
    %cst_82 = arith.constant 1.000000e+00 : f32
    %451 = vector.broadcast %cst_82 : f32 to vector<2x32xf32>
    %452 = arith.addf %451, %450 : vector<2x32xf32>
    %453 = arith.divf %451, %452 : vector<2x32xf32>
    %454 = vector.extract_strided_slice %441 {offsets = [0, 64], sizes = [2, 32], strides = [1, 1]} : vector<2x128xf32> to vector<2x32xf32>
    %455 = math.tanh %454 : vector<2x32xf32>
    %456 = vector.extract_strided_slice %441 {offsets = [0, 96], sizes = [2, 32], strides = [1, 1]} : vector<2x128xf32> to vector<2x32xf32>
    %457 = arith.negf %456 : vector<2x32xf32>
    %458 = math.exp %457 : vector<2x32xf32>
    %cst_83 = arith.constant 1.000000e+00 : f32
    %459 = vector.broadcast %cst_83 : f32 to vector<2x32xf32>
    %460 = arith.addf %459, %458 : vector<2x32xf32>
    %461 = arith.divf %459, %460 : vector<2x32xf32>
    %462 = arith.mulf %453, %407 : vector<2x32xf32>
    %463 = arith.mulf %447, %455 : vector<2x32xf32>
    %464 = arith.addf %462, %463 : vector<2x32xf32>
    %465 = math.tanh %464 : vector<2x32xf32>
    %466 = arith.mulf %461, %465 : vector<2x32xf32>
    %c14 = arith.constant 14 : index
    %c0_84 = arith.constant 0 : index
    %467 = vector.load %arg10[%c14, %c0_84] : memref<16x32xf32, #tpu.memory_space<vmem>>, vector<2x32xf32>
    tpu.vector_store %arg10[%c14, %c0_84], %466 {strides = array<i32>} : memref<16x32xf32, #tpu.memory_space<vmem>>, vector<2x32xf32>,
    %c0_85 = arith.constant 0 : index
    %c0_86 = arith.constant 0 : index
    %468 = vector.load %arg10[%c0_85, %c0_86] : memref<16x32xf32, #tpu.memory_space<vmem>>, vector<16x32xf32>
    %c0_87 = arith.constant 0 : index
    %c0_88 = arith.constant 0 : index
    %469 = vector.load %arg7[%c0_87, %c0_88] : memref<32x1xf32, #tpu.memory_space<vmem>>, vector<32x1xf32>
    %cst_89 = arith.constant dense<0.000000e+00> : vector<16x1xf32>
    %470 = tpu.matmul %468, %469, %cst_89 {dimension_numbers = #tpu.dot_dimension_numbers<[1], [0], [0], [1], [0, 0, 1, 1], [], []>} : vector<16x32xf32>, vector<32x1xf32>, vector<16x1xf32> -> vector<16x1xf32>
    %c0_90 = arith.constant 0 : index
    %c0_91 = arith.constant 0 : index
    %471 = vector.load %arg8[%c0_90, %c0_91] : memref<1x1xf32, #tpu.memory_space<vmem>>, vector<1x1xf32>
    %472 = vector.broadcast %471 : vector<1x1xf32> to vector<16x1xf32>
    %473 = arith.addf %470, %472 : vector<16x1xf32>
    %c0_92 = arith.constant 0 : index
    %c0_93 = arith.constant 0 : index
    %474 = vector.load %arg9[%c0_92, %c0_93] : memref<16x1xf32, #tpu.memory_space<vmem>>, vector<16x1xf32>
    tpu.vector_store %arg9[%c0_92, %c0_93], %473 {strides = array<i32>} : memref<16x1xf32, #tpu.memory_space<vmem>>, vector<16x1xf32>,
    return
  }
  func.func @transform_0(%arg0: i32) -> (i32, i32) {
    %c0_i32 = arith.constant 0 : i32
    %c0_i32_0 = arith.constant 0 : i32
    %c0_i32_1 = arith.constant 0 : i32
    return %c0_i32, %c0_i32_0 : i32, i32
  }
  func.func @transform_1(%arg0: i32) -> (i32, i32) {
    %c0_i32 = arith.constant 0 : i32
    %c0_i32_0 = arith.constant 0 : i32
    %c0_i32_1 = arith.constant 0 : i32
    return %c0_i32, %c0_i32_0 : i32, i32
  }
  func.func @transform_2(%arg0: i32) -> (i32, i32) {
    %c0_i32 = arith.constant 0 : i32
    %c0_i32_0 = arith.constant 0 : i32
    %c0_i32_1 = arith.constant 0 : i32
    return %c0_i32, %c0_i32_0 : i32, i32
  }
  func.func @transform_3(%arg0: i32) -> (i32, i32) {
    %c0_i32 = arith.constant 0 : i32
    %c0_i32_0 = arith.constant 0 : i32
    %c0_i32_1 = arith.constant 0 : i32
    return %c0_i32, %c0_i32_0 : i32, i32
  }
  func.func @transform_4(%arg0: i32) -> (i32, i32) {
    %c0_i32 = arith.constant 0 : i32
    %c0_i32_0 = arith.constant 0 : i32
    %c0_i32_1 = arith.constant 0 : i32
    return %c0_i32, %c0_i32_0 : i32, i32
  }
  func.func @transform_5(%arg0: i32) -> (i32, i32) {
    %c0_i32 = arith.constant 0 : i32
    %c0_i32_0 = arith.constant 0 : i32
    %c0_i32_1 = arith.constant 0 : i32
    return %c0_i32, %c0_i32_0 : i32, i32
  }
  func.func @transform_6(%arg0: i32) -> (i32, i32) {
    %c0_i32 = arith.constant 0 : i32
    %c0_i32_0 = arith.constant 0 : i32
    %c0_i32_1 = arith.constant 0 : i32
    return %c0_i32, %c0_i32_0 : i32, i32
  }
  func.func @transform_7(%arg0: i32) -> (i32, i32) {
    %c0_i32 = arith.constant 0 : i32
    %c0_i32_0 = arith.constant 0 : i32
    %c0_i32_1 = arith.constant 0 : i32
    return %c0_i32, %c0_i32_0 : i32, i32
  }
  func.func @transform_8(%arg0: i32) -> (i32, i32) {
    %c0_i32 = arith.constant 0 : i32
    %c0_i32_0 = arith.constant 0 : i32
    %c0_i32_1 = arith.constant 0 : i32
    return %c0_i32, %c0_i32_0 : i32, i32
  }
}

</mosaic_0001>

<bundles_post_ra>
// kernel: tpu_custom_call.1
= control target key start
LH: loop header
LB: loop body
LE: loop exit
PB: predicated region body
PF: predicated region fallthrough
CT: control target
= control target key end

     0   :  { %s3132_s0 = inlined_call_operand.vmem [shape: f32[16,4], index: 0, kind: input, shape index: {}]   ;;  %s3133_s1 = inlined_call_operand.vmem [shape: f32[4,128], index: 1, kind: input, shape index: {}]   ;;  %s3134_s2 = inlined_call_operand.vmem [shape: f32[32,128], index: 2, kind: input, shape index: {}]   ;;  %s3135_s3 = inlined_call_operand.vmem [shape: f32[1,128], index: 3, kind: input, shape index: {}]   ;;  %s3136_s4 = inlined_call_operand.hbm [shape: f32[64,128], index: 4, kind: input, shape index: {}]   ;;  %s3137_s5 = inlined_call_operand.vmem [shape: f32[1,128], index: 5, kind: input, shape index: {}]   ;;  %s3138_s6 = inlined_call_operand.vmem [shape: f32[32,1], index: 6, kind: input, shape index: {}]   ;;  %s3139_s7 = inlined_call_operand.<no memory space> [shape: f32[1,1], index: 7, kind: input, shape index: {}]   ;;  %s3140_s8 = inlined_call_operand.vmem [shape: f32[16,1], index: 8, kind: output, shape index: {}]  }
   0x1   :  { %v13_v0 = vstv %s3139_s7 }
   0x2   :  { %14 = vst [vmem:[#allocation3] sm:$0x1] %v13_v0 }
   0x3   :  { %15 = vsyncpa [#allocation5], 0  ;;  %s2571_s29 = smov [#allocation4]  }
   0x4   :  { %s29_s30 = sshll.u32 %s2571_s29, 4  ;;  %s30_s30 = int_to_ptr.vmem [resolvable:$true] %s29_s30 }
   0x5   :  { %s2557_s9 = scalar_lea.vmem %s30_s30, 1024  ;;  %p2562_p1 = scmp.lt.s32.totalorder %s30_s30, %s30_s30 }
   0x6   :  { %p2558_p0 = scmp.ne.s32.totalorder %s30_s30, %s2557_s9  ;;  %p2563_p2 = scmp.lt.s32.totalorder %s2557_s9, %s2557_s9 }
   0x8   :  { %p2564_p3 = por %p2563_p2, %p2562_p1 }
   0xa   :  { %p2565_p4 = pnand %p2564_p3, %p2558_p0 }
   0xc   :  { %2568 = shalt.err (!%p2565_p4)
}
   0xd   :  { %s2572_s10 = smov 128   ;;  %s2573_s11 = smov 8  }
   0xe   :  { %35 = dma.hbm_to_vmem [thread:$0]  %s3136_s4, 1024, %s30_s30, [#allocation5], %s2572_s10, %s2572_s10, %s2573_s11  }
   0xf   :  { %2569 = dma.done.wait [#allocation5], 1024  }
  0x10   :  { %2570 = vsyncadd [#allocation5], 4294966272  ;;  %v2574_v1 = vmov 0.0   ;;  %vm2575_vm0 = vmmov 0   ;;  %vm62_vm1 = vcmask 1043456   ;;  %vm55_vm2 = vcmask 31744  }
  0x11   :  { %2150 = vmatprep.subr.mxu1 %v2574_v1  ;;  %2158 = vmatprep.mubr.msk.f32.mxu1 %vm2575_vm0, %v2574_v1  ;;  %v47_v2 = vld [vmem:[%s3133_s1] sm:$0xf]  ;;  %v2638_v3 = vld [vmem:[%s3134_s2 + $0x18] sm:$0xff]  ;;  %v46_v5 = vld [vmem:[%s3132_s0 + $0x8] sm:$0xff]  ;;  %s2576_s26 = smov 64   ;;  %vm160_vm3 = vcmask 261120  }
  0x12   :  { %v45_v4 = vld [vmem:[%s3132_s0] sm:$0xff]  ;;  %2145 = vmatprep.subr.msk.mxu0 %vm62_vm1, %v47_v2  ;;  %2151 = vmatpush3.msra.mxu1 %v2638_v3  ;;  %v2650_v6 = vld [vmem:[%s3134_s2 + $0x10] sm:$0xff]  ;;  %v2656_v7 = vld [vmem:[%s3134_s2 + $0x8] sm:$0xff]  ;;  %vm264_vm4 = vcmask 523264   ;;  %vm366_vm5 = vcmask 254976   ;;  %vm1977_vm6 = vcmask 7168  }
  0x13   :  { %2146 = vmatpush3.msk.msra.mxu0 %vm62_vm1, %v47_v2  ;;  %2147 = vmatprep.mubr.msk.f32.mxu0 %vm55_vm2, %v45_v4  ;;  %v2664_v8 = vld [vmem:[%s3134_s2] sm:$0xff]  ;;  %v2696_v27 = vld [vmem:[#allocation4 + $0x38] sm:$0xff]  ;;  %v2706_v30 = vld [vmem:[#allocation4 + $0x20] sm:$0xff] }
  0x14   :  { %2152 = vmatprep.subr.mxu1 %v2574_v1  ;;  %2148 = vmatmul.mubr.msk.f32.vlgmr.msra.gmra.mxu0 %vm55_vm2, %v46_v5  ;;  %v1985_v9 = vld [vmem:[%s3135_s3] ss:$0 sm:$0xff]  ;;  %s2577_s3 = smov 32   ;;  %v2698_v28 = vld [vmem:[#allocation4 + $0x30] sm:$0xff]  ;;  %v2710_v31 = vld [vmem:[#allocation4 + $0x18] sm:$0xff] }
  0x15   :  { %2153 = vmatpush3.msra.mxu1 %v2650_v6  ;;  %2161 = vmatprep.subr.mxu0 %v2574_v1  ;;  %v2702_v29 = vld [vmem:[#allocation4 + $0x28] sm:$0xff]  ;;  %v2714_v32 = vld [vmem:[#allocation4 + $0x10] sm:$0xff]  ;;  %v2725_v35 = vld [vmem:[#allocation4] sm:$0xff] }
  0x16   :  { %2154 = vmatprep.subr.mxu1 %v2574_v1  ;;  %2177 = vmatprep.mubr.msk.f32.mxu0 %vm2575_vm0, %v2574_v1  ;;  %v2718_v34 = vld [vmem:[#allocation4 + $0x8] sm:$0xff] }
  0x17   :  { %2155 = vmatpush3.msra.mxu1 %v2656_v7  ;;  %2162 = vmatpush3.msra.mxu0 %v2696_v27  ;;  %v2764_v40 = vld [vmem:[%s3137_s5] ss:$0 sm:$0xff] }
  0x18   :  { %2156 = vmatprep.subr.mxu1 %v2574_v1  ;;  %2163 = vmatprep.subr.mxu0 %v2574_v1 }
  0x19   :  { %2157 = vmatpush3.msra.mxu1 %v2664_v8  ;;  %2164 = vmatpush3.msra.mxu0 %v2698_v28 }
  0x1a   :  { %2159 = vmatmul.mubr.f32.vlgmr.msra.gmra.mxu1 %v2574_v1  ;;  %2180 = vmatprep.subr.mxu1 %v2574_v1 }
  0x1b   :  { %2181 = vmatpush3.msra.mxu1 %v2638_v3  ;;  %2188 = vmatprep.mubr.msk.f32.mxu1 %vm2575_vm0, %v2574_v1 }
  0x1c   :  { %2182 = vmatprep.subr.mxu1 %v2574_v1  ;;  %2165 = vmatprep.subr.mxu0 %v2574_v1 }
  0x1d   :  { %2183 = vmatpush3.msra.mxu1 %v2650_v6  ;;  %2166 = vmatpush3.msra.mxu0 %v2702_v29 }
  0x1e   :  { %2184 = vmatprep.subr.mxu1 %v2574_v1  ;;  %2167 = vmatprep.subr.mxu0 %v2574_v1 }
  0x1f   :  { %2185 = vmatpush3.msra.mxu1 %v2656_v7  ;;  %2168 = vmatpush3.msra.mxu0 %v2706_v30 }
  0x20   :  { %2186 = vmatprep.subr.mxu1 %v2574_v1  ;;  %2169 = vmatprep.subr.mxu0 %v2574_v1 }
  0x21   :  { %2187 = vmatpush3.msra.mxu1 %v2664_v8  ;;  %2170 = vmatpush3.msra.mxu0 %v2710_v31 }
  0x22   :  { %2191 = vmatprep.subr.mxu1 %v2574_v1  ;;  %2171 = vmatprep.subr.mxu0 %v2574_v1 }
  0x23   :  { %2172 = vmatpush3.msra.mxu0 %v2714_v32 }
  0x24   :  { %2173 = vmatprep.subr.mxu0 %v2574_v1 }
  0x25   :  { %2174 = vmatpush3.msra.mxu0 %v2718_v34 }
  0x26   :  { %2175 = vmatprep.subr.mxu0 %v2574_v1 }
  0x27   :  { %2176 = vmatpush3.msra.mxu0 %v2725_v35 }
  0x28   :  { %2210 = vmatprep.subr.mxu0 %v2574_v1 }
  0xd4   :  { %v2149_v10 = vpop.f32.mrf.mxu0 }
  0xd5   :  { %v2686_v11 = vadd.f32 %v2149_v10, %v1985_v9 }
  0xd6   :  { %v132_v12 = vpop.f32.mrf.mxu0 }
  0xd7   :  { %v2688_v13 = vadd.f32 %v1985_v9, %v132_v12 }
  0xda   :  { %v230_v14 = vpop.f32.mrf.mxu1 }
  0xdb   :  { %v234_v15 = vadd.f32 %v230_v14, %v2688_v13 }
  0xdc   :  { %v2160_v16 = vpop.f32.mrf.mxu1 }
  0xdd   :  { %2408 = vtanh.f32 %v234_v15  ;;  %v1990_v18 = vmul.f32 -1.442695, %v234_v15 }
  0xdf   :  { %2410 = vpow2.f32 %v1990_v18 }
  0xea   :  { %v2409_v17 = vpop.eup %2408 }
  0xeb   :  { %244 = vrot.lane.b32.xlu0 %v2409_v17, %s2576_s26 }
  0xec   :  { %v2411_v19 = vpop.eup %2410 }
  0xed   :  { %v238_v20 = vadd.f32 1.0, %v2411_v19 }
  0xef   :  { %2412 = vrcp.f32 %v238_v20 }
  0xfc   :  { %v2413_v21 = vpop.eup %2412 }
  0xfd   :  { %v242_v24 = vmul.f32 0.0, %v2413_v21 }
 0x15d   :  { %v245_v22 = vpop.permute.xlu0 %244 }
 0x15e   :  { %v247_v23 = vmul.f32 %v2413_v21, %v245_v22 }
 0x160   :  { %249 = vrot.lane.b32.xlu0 %v247_v23, %s2577_s3 }
 0x1d2   :  { %v250_v25 = vpop.permute.xlu0 %249 }
 0x1d3   :  { %v2693_v26 = vadd.f32 %v250_v25, %v242_v24 }
 0x1d5   :  { %2414 = vtanh.f32 %v2693_v26  ;;  %v452_v62 = vrot.slane %v2693_v26, 6 }
 0x1e2   :  { %v2415_v33 = vpop.eup %2414 }
 0x1e3   :  { %255 = vrot.lane.b32.xlu1 %v2415_v33, %s2576_s26 }
 0x255   :  { %v256_v36 = vpop.permute.xlu1 %255 }
 0x256   :  { %v258_v37 = vmul.f32 %v2413_v21, %v256_v36 }
 0x258   :  { %260 = vrot.lane.b32.xlu1 %v258_v37, %s2577_s3 }
 0x2ca   :  { %v261_v38 = vpop.permute.xlu1 %260 }
 0x2cb   :  { %v263_v39 = vsel %vm160_vm3, %v261_v38, 0.0  ;;  %2189 = vmatmul.mubr.msk.f32.vlgmr.msra.gmra.mxu1 %vm160_vm3, %v261_v38 }
 0x2cc   :  { %2178 = vmatmul.mubr.msk.f32.vlgmr.msra.gmra.mxu0 %vm264_vm4, %v263_v39  ;;  %2192 = vmatpush3.msra.mxu1 %v2696_v27 }
 0x2cd   :  { %2193 = vmatprep.subr.mxu1 %v2574_v1  ;;  %2211 = vmatpush3.msra.mxu0 %v2638_v3 }
 0x2ce   :  { %2194 = vmatpush3.msra.mxu1 %v2698_v28  ;;  %2212 = vmatprep.subr.mxu0 %v2574_v1 }
 0x2cf   :  { %2195 = vmatprep.subr.mxu1 %v2574_v1  ;;  %2213 = vmatpush3.msra.mxu0 %v2650_v6 }
 0x2d0   :  { %2196 = vmatpush3.msra.mxu1 %v2702_v29  ;;  %2214 = vmatprep.subr.mxu0 %v2574_v1 }
 0x2d1   :  { %2197 = vmatprep.subr.mxu1 %v2574_v1  ;;  %2215 = vmatpush3.msra.mxu0 %v2656_v7 }
 0x2d2   :  { %2198 = vmatpush3.msra.mxu1 %v2706_v30  ;;  %2216 = vmatprep.subr.mxu0 %v2574_v1 }
 0x2d3   :  { %2199 = vmatprep.subr.mxu1 %v2574_v1  ;;  %2207 = vmatprep.mubr.msk.f32.mxu1 %vm2575_vm0, %v2574_v1 }
 0x2d4   :  { %2200 = vmatpush3.msra.mxu1 %v2710_v31  ;;  %2217 = vmatpush3.msra.mxu0 %v2664_v8 }
 0x2d5   :  { %2201 = vmatprep.subr.mxu1 %v2574_v1  ;;  %2218 = vmatprep.mubr.msk.f32.mxu0 %vm2575_vm0, %v2574_v1 }
 0x2d6   :  { %2202 = vmatpush3.msra.mxu1 %v2714_v32  ;;  %2221 = vmatprep.subr.mxu0 %v2574_v1 }
 0x2d7   :  { %2203 = vmatprep.subr.mxu1 %v2574_v1 }
 0x2d8   :  { %2204 = vmatpush3.msra.mxu1 %v2718_v34 }
 0x2d9   :  { %2205 = vmatprep.subr.mxu1 %v2574_v1 }
 0x2da   :  { %2206 = vmatpush3.msra.mxu1 %v2725_v35 }
 0x2db   :  { %2240 = vmatprep.subr.mxu1 %v2574_v1 }
 0x38b   :  { %v436_v41 = vpop.f32.mrf.mxu1 }
 0x38c   :  { %v441_v42 = vrot.slane %v436_v41, 6  ;;  %v334_v43 = vpop.f32.mrf.mxu0 }
 0x38d   :  { %v335_v44 = vadd.f32 %v2764_v40, %v334_v43  ;;  %v2190_v45 = vpop.f32.mrf.mxu1 }
 0x38e   :  { %v443_v46 = vadd.f32 %v441_v42, %v2688_v13  ;;  %v2179_v47 = vpop.f32.mrf.mxu0 }
 0x38f   :  { %2416 = vtanh.f32 %v335_v44  ;;  %v1992_v50 = vmul.f32 -1.442695, %v335_v44 }
 0x390   :  { %2418 = vtanh.f32 %v443_v46  ;;  %v1994_v51 = vmul.f32 -1.442695, %v443_v46 }
 0x391   :  { %2420 = vpow2.f32 %v1992_v50 }
 0x392   :  { %2422 = vpow2.f32 %v1994_v51 }
 0x39c   :  { %v2417_v48 = vpop.eup %2416 }
 0x39d   :  { %v2419_v49 = vpop.eup %2418  ;;  %347 = vrot.lane.b32.xlu0 %v2417_v48, %s2576_s26 }
 0x39e   :  { %456 = vrot.lane.b32.xlu1 %v2419_v49, %s2576_s26  ;;  %v2421_v52 = vpop.eup %2420 }
 0x39f   :  { %v2423_v53 = vpop.eup %2422  ;;  %v341_v54 = vadd.f32 1.0, %v2421_v52 }
 0x3a0   :  { %v447_v55 = vadd.f32 1.0, %v2423_v53 }
 0x3a1   :  { %2424 = vrcp.f32 %v341_v54 }
 0x3a2   :  { %2426 = vrcp.f32 %v447_v55 }
 0x3ae   :  { %v2425_v56 = vpop.eup %2424 }
 0x3af   :  { %v2427_v58 = vpop.eup %2426  ;;  %v345_v63 = vmul.f32 0.0, %v2425_v56 }
 0x3b0   :  { %v454_v2 = vmul.f32 %v2427_v58, %v452_v62 }
 0x40f   :  { %v348_v57 = vpop.permute.xlu0 %347 }
 0x410   :  { %v350_v59 = vmul.f32 %v2425_v56, %v348_v57  ;;  %v457_v60 = vpop.permute.xlu1 %456 }
 0x411   :  { %v459_v61 = vmul.f32 %v2427_v58, %v457_v60 }
 0x412   :  { %352 = vrot.lane.b32.xlu0 %v350_v59, %s2577_s3 }
 0x413   :  { %461 = vrot.lane.b32.xlu1 %v459_v61, %s2577_s3 }
 0x484   :  { %v353_v0 = vpop.permute.xlu0 %352 }
 0x485   :  { %v2773_v4 = vadd.f32 %v353_v0, %v345_v63  ;;  %v462_v5 = vpop.permute.xlu1 %461 }
 0x486   :  { %v2775_v9 = vadd.f32 %v462_v5, %v454_v2 }
 0x487   :  { %2428 = vtanh.f32 %v2773_v4 }
 0x488   :  { %2430 = vtanh.f32 %v2775_v9 }
 0x494   :  { %v2429_v10 = vpop.eup %2428 }
 0x495   :  { %v2431_v12 = vpop.eup %2430  ;;  %358 = vrot.lane.b32.xlu0 %v2429_v10, %s2576_s26 }
 0x496   :  { %467 = vrot.lane.b32.xlu1 %v2431_v12, %s2576_s26 }
 0x507   :  { %v359_v14 = vpop.permute.xlu0 %358 }
 0x508   :  { %v2781_v15 = vmul.f32 %v2425_v56, %v359_v14  ;;  %v468_v16 = vpop.permute.xlu1 %467  ;;  %v670_v56 = vrot.slane %v2775_v9, 6 }
 0x509   :  { %v470_v17 = vmul.f32 %v2427_v58, %v468_v16 }
 0x50a   :  { %v475_v18 = vrot.slane %v2781_v15, 6 }
 0x50b   :  { %472 = vrot.lane.b32.xlu0 %v470_v17, %s2577_s3  ;;  %v583_v19 = vrot.slane %v470_v17, 2 }
 0x50c   :  { %476 = vrot.lane.b32.xlu1 %v475_v18, %s2576_s26 }
 0x50f   :  { %584 = vrot.lane.b32.xlu0 %v583_v19, %s2577_s3 }
 0x57d   :  { %v473_v20 = vpop.permute.xlu0 %472 }
 0x57e   :  { %v477_v21 = vpop.permute.xlu1 %476 }
 0x57f   :  { %v479_v22 = vsel %vm160_vm3, %v473_v20, %v477_v21 }
 0x580   :  { %v481_v23 = vrot.slane %v479_v22, 2 }
 0x581   :  { %v585_v24 = vpop.permute.xlu0 %584 }
 0x582   :  { %2208 = vmatmul.mubr.msk.f32.vlgmr.msra.gmra.mxu1 %vm264_vm4, %v481_v23  ;;  %2219 = vmatmul.mubr.msk.f32.vlgmr.msra.gmra.mxu0 %vm160_vm3, %v585_v24 }
 0x583   :  { %2222 = vmatpush3.msra.mxu0 %v2696_v27  ;;  %2241 = vmatpush3.msra.mxu1 %v2638_v3 }
 0x584   :  { %2223 = vmatprep.subr.mxu0 %v2574_v1  ;;  %2242 = vmatprep.subr.mxu1 %v2574_v1 }
 0x585   :  { %2224 = vmatpush3.msra.mxu0 %v2698_v28  ;;  %2243 = vmatpush3.msra.mxu1 %v2650_v6 }
 0x586   :  { %2225 = vmatprep.subr.mxu0 %v2574_v1  ;;  %2244 = vmatprep.subr.mxu1 %v2574_v1 }
 0x587   :  { %2226 = vmatpush3.msra.mxu0 %v2702_v29  ;;  %2245 = vmatpush3.msra.mxu1 %v2656_v7 }
 0x588   :  { %2227 = vmatprep.subr.mxu0 %v2574_v1  ;;  %2237 = vmatprep.mubr.msk.f32.mxu0 %vm2575_vm0, %v2574_v1 }
 0x589   :  { %2228 = vmatpush3.msra.mxu0 %v2706_v30  ;;  %2246 = vmatprep.subr.mxu1 %v2574_v1 }
 0x58a   :  { %2229 = vmatprep.subr.mxu0 %v2574_v1  ;;  %2247 = vmatpush3.msra.mxu1 %v2664_v8 }
 0x58b   :  { %2230 = vmatpush3.msra.mxu0 %v2710_v31  ;;  %2248 = vmatprep.mubr.msk.f32.mxu1 %vm2575_vm0, %v2574_v1 }
 0x58c   :  { %2231 = vmatprep.subr.mxu0 %v2574_v1  ;;  %2251 = vmatprep.subr.mxu1 %v2574_v1 }
 0x58d   :  { %2232 = vmatpush3.msra.mxu0 %v2714_v32 }
 0x58e   :  { %2233 = vmatprep.subr.mxu0 %v2574_v1 }
 0x58f   :  { %2234 = vmatpush3.msra.mxu0 %v2718_v34 }
 0x590   :  { %2235 = vmatprep.subr.mxu0 %v2574_v1 }
 0x591   :  { %2236 = vmatpush3.msra.mxu0 %v2725_v35 }
 0x592   :  { %2270 = vmatprep.subr.mxu0 %v2574_v1 }
 0x642   :  { %v550_v25 = vpop.f32.mrf.mxu1  ;;  %v654_v26 = vpop.f32.mrf.mxu0 }
 0x643   :  { %v551_v33 = vadd.f32 %v2764_v40, %v550_v25  ;;  %v659_v36 = vrot.slane %v654_v26, 4 }
 0x644   :  { %v2209_v37 = vpop.f32.mrf.mxu1  ;;  %v2220_v38 = vpop.f32.mrf.mxu0 }
 0x645   :  { %2432 = vtanh.f32 %v551_v33  ;;  %v661_v39 = vadd.f32 %v659_v36, %v2688_v13  ;;  %v1996_v43 = vmul.f32 -1.442695, %v551_v33 }
 0x647   :  { %2434 = vtanh.f32 %v661_v39  ;;  %v1998_v44 = vmul.f32 -1.442695, %v661_v39 }
 0x648   :  { %2436 = vpow2.f32 %v1996_v43 }
 0x649   :  { %2438 = vpow2.f32 %v1998_v44 }
 0x652   :  { %v2433_v41 = vpop.eup %2432 }
 0x653   :  { %563 = vrot.lane.b32.xlu1 %v2433_v41, %s2576_s26 }
 0x654   :  { %v2435_v42 = vpop.eup %2434 }
 0x655   :  { %674 = vrot.lane.b32.xlu0 %v2435_v42, %s2576_s26  ;;  %v2437_v45 = vpop.eup %2436 }
 0x656   :  { %v2439_v46 = vpop.eup %2438  ;;  %v557_v47 = vadd.f32 1.0, %v2437_v45 }
 0x657   :  { %v665_v48 = vadd.f32 1.0, %v2439_v46 }
 0x658   :  { %2440 = vrcp.f32 %v557_v47 }
 0x659   :  { %2442 = vrcp.f32 %v665_v48 }
 0x665   :  { %v2441_v49 = vpop.eup %2440 }
 0x666   :  { %v2443_v52 = vpop.eup %2442  ;;  %v561_v55 = vmul.f32 %v2441_v49, %v2773_v4 }
 0x667   :  { %v672_v59 = vmul.f32 %v2443_v52, %v670_v56 }
 0x6c5   :  { %v564_v50 = vpop.permute.xlu1 %563 }
 0x6c6   :  { %v566_v51 = vmul.f32 %v2441_v49, %v564_v50 }
 0x6c7   :  { %v675_v53 = vpop.permute.xlu0 %674 }
 0x6c8   :  { %568 = vrot.lane.b32.xlu1 %v566_v51, %s2577_s3  ;;  %v677_v54 = vmul.f32 %v2443_v52, %v675_v53 }
 0x6ca   :  { %679 = vrot.lane.b32.xlu0 %v677_v54, %s2577_s3 }
 0x73a   :  { %v569_v57 = vpop.permute.xlu1 %568 }
 0x73b   :  { %v2826_v58 = vadd.f32 %v569_v57, %v561_v55 }
 0x73c   :  { %v680_v60 = vpop.permute.xlu0 %679 }
 0x73d   :  { %2444 = vtanh.f32 %v2826_v58  ;;  %v2829_v61 = vadd.f32 %v680_v60, %v672_v59 }
 0x73f   :  { %2446 = vtanh.f32 %v2829_v61 }
 0x74a   :  { %v2445_v62 = vpop.eup %2444 }
 0x74b   :  { %574 = vrot.lane.b32.xlu1 %v2445_v62, %s2576_s26 }
 0x74c   :  { %v2447_v63 = vpop.eup %2446 }
 0x74d   :  { %685 = vrot.lane.b32.xlu0 %v2447_v63, %s2576_s26 }
 0x7bd   :  { %v575_v0 = vpop.permute.xlu1 %574 }
 0x7be   :  { %v2834_v2 = vmul.f32 %v2441_v49, %v575_v0  ;;  %v888_v49 = vrot.slane %v2829_v61, 6 }
 0x7bf   :  { %v686_v5 = vpop.permute.xlu0 %685 }
 0x7c0   :  { %v693_v4 = vrot.slane %v2834_v2, 4  ;;  %v688_v9 = vmul.f32 %v2443_v52, %v686_v5 }
 0x7c2   :  { %694 = vrot.lane.b32.xlu0 %v693_v4, %s2576_s26  ;;  %690 = vrot.lane.b32.xlu1 %v688_v9, %s2577_s3  ;;  %v801_v10 = vrot.slane %v688_v9, 4 }
 0x7c6   :  { %802 = vrot.lane.b32.xlu1 %v801_v10, %s2577_s3 }
 0x834   :  { %v695_v12 = vpop.permute.xlu0 %694  ;;  %v691_v14 = vpop.permute.xlu1 %690 }
 0x835   :  { %v697_v16 = vsel %vm160_vm3, %v691_v14, %v695_v12 }
 0x836   :  { %v699_v17 = vrot.slane %v697_v16, 4 }
 0x838   :  { %v803_v18 = vpop.permute.xlu1 %802  ;;  %2238 = vmatmul.mubr.msk.f32.vlgmr.msra.gmra.mxu0 %vm264_vm4, %v699_v17 }
 0x839   :  { %2249 = vmatmul.mubr.msk.f32.vlgmr.msra.gmra.mxu1 %vm160_vm3, %v803_v18  ;;  %2271 = vmatpush3.msra.mxu0 %v2638_v3 }
 0x83a   :  { %2252 = vmatpush3.msra.mxu1 %v2696_v27  ;;  %2272 = vmatprep.subr.mxu0 %v2574_v1 }
 0x83b   :  { %2253 = vmatprep.subr.mxu1 %v2574_v1  ;;  %2273 = vmatpush3.msra.mxu0 %v2650_v6 }
 0x83c   :  { %2254 = vmatpush3.msra.mxu1 %v2698_v28  ;;  %2274 = vmatprep.subr.mxu0 %v2574_v1 }
 0x83d   :  { %2255 = vmatprep.subr.mxu1 %v2574_v1  ;;  %2275 = vmatpush3.msra.mxu0 %v2656_v7 }
 0x83e   :  { %2256 = vmatpush3.msra.mxu1 %v2702_v29  ;;  %2267 = vmatprep.mubr.msk.f32.mxu1 %vm2575_vm0, %v2574_v1 }
 0x83f   :  { %2257 = vmatprep.subr.mxu1 %v2574_v1  ;;  %2276 = vmatprep.subr.mxu0 %v2574_v1 }
 0x840   :  { %2258 = vmatpush3.msra.mxu1 %v2706_v30  ;;  %2277 = vmatpush3.msra.mxu0 %v2664_v8 }
 0x841   :  { %2259 = vmatprep.subr.mxu1 %v2574_v1  ;;  %2278 = vmatprep.mubr.msk.f32.mxu0 %vm2575_vm0, %v2574_v1 }
 0x842   :  { %2260 = vmatpush3.msra.mxu1 %v2710_v31  ;;  %2281 = vmatprep.subr.mxu0 %v2574_v1 }
 0x843   :  { %2261 = vmatprep.subr.mxu1 %v2574_v1 }
 0x844   :  { %2262 = vmatpush3.msra.mxu1 %v2714_v32 }
 0x845   :  { %2263 = vmatprep.subr.mxu1 %v2574_v1 }
 0x846   :  { %2264 = vmatpush3.msra.mxu1 %v2718_v34 }
 0x847   :  { %2265 = vmatprep.subr.mxu1 %v2574_v1 }
 0x848   :  { %2266 = vmatpush3.msra.mxu1 %v2725_v35 }
 0x849   :  { %2300 = vmatprep.subr.mxu1 %v2574_v1 }
 0x8f8   :  { %v768_v19 = vpop.f32.mrf.mxu0 }
 0x8f9   :  { %v769_v20 = vadd.f32 %v2764_v40, %v768_v19  ;;  %v872_v21 = vpop.f32.mrf.mxu1 }
 0x8fa   :  { %v877_v22 = vrot.slane %v872_v21, 2  ;;  %v2239_v23 = vpop.f32.mrf.mxu0 }
 0x8fb   :  { %2448 = vtanh.f32 %v769_v20  ;;  %v2250_v24 = vpop.f32.mrf.mxu1  ;;  %v2000_v36 = vmul.f32 -1.442695, %v769_v20 }
 0x8fc   :  { %v879_v25 = vadd.f32 %v877_v22, %v2688_v13 }
 0x8fe   :  { %2450 = vtanh.f32 %v879_v25  ;;  %v2002_v37 = vmul.f32 -1.442695, %v879_v25 }
 0x8ff   :  { %2452 = vpow2.f32 %v2000_v36 }
 0x900   :  { %2454 = vpow2.f32 %v2002_v37 }
 0x908   :  { %v2449_v26 = vpop.eup %2448 }
 0x909   :  { %781 = vrot.lane.b32.xlu0 %v2449_v26, %s2576_s26 }
 0x90b   :  { %v2451_v33 = vpop.eup %2450 }
 0x90c   :  { %892 = vrot.lane.b32.xlu1 %v2451_v33, %s2576_s26  ;;  %v2453_v38 = vpop.eup %2452 }
 0x90d   :  { %v2455_v39 = vpop.eup %2454  ;;  %v775_v41 = vadd.f32 1.0, %v2453_v38 }
 0x90e   :  { %v883_v42 = vadd.f32 1.0, %v2455_v39 }
 0x90f   :  { %2456 = vrcp.f32 %v775_v41 }
 0x910   :  { %2458 = vrcp.f32 %v883_v42 }
 0x91c   :  { %v2457_v43 = vpop.eup %2456 }
 0x91d   :  { %v2459_v45 = vpop.eup %2458  ;;  %v779_v48 = vmul.f32 %v2457_v43, %v2826_v58 }
 0x91e   :  { %v890_v52 = vmul.f32 %v2459_v45, %v888_v49 }
 0x97b   :  { %v782_v44 = vpop.permute.xlu0 %781 }
 0x97c   :  { %v784_v13 = vmul.f32 %v2457_v43, %v782_v44 }
 0x97e   :  { %v893_v46 = vpop.permute.xlu1 %892  ;;  %786 = vrot.lane.b32.xlu0 %v784_v13, %s2577_s3 }
 0x97f   :  { %v895_v47 = vmul.f32 %v2459_v45, %v893_v46 }
 0x981   :  { %897 = vrot.lane.b32.xlu1 %v895_v47, %s2577_s3 }
 0x9f0   :  { %v787_v50 = vpop.permute.xlu0 %786 }
 0x9f1   :  { %v2879_v51 = vadd.f32 %v787_v50, %v779_v48 }
 0x9f3   :  { %2460 = vtanh.f32 %v2879_v51  ;;  %v898_v53 = vpop.permute.xlu1 %897 }
 0x9f4   :  { %v2882_v54 = vadd.f32 %v898_v53, %v890_v52 }
 0x9f6   :  { %2462 = vtanh.f32 %v2882_v54  ;;  %v1103_v42 = vrot.slane %v2882_v54, 6 }
 0xa00   :  { %v2461_v55 = vpop.eup %2460 }
 0xa01   :  { %792 = vrot.lane.b32.xlu0 %v2461_v55, %s2576_s26 }
 0xa03   :  { %v2463_v56 = vpop.eup %2462 }
 0xa04   :  { %903 = vrot.lane.b32.xlu1 %v2463_v56, %s2576_s26 }
 0xa73   :  { %v793_v57 = vpop.permute.xlu0 %792 }
 0xa74   :  { %v2887_v58 = vmul.f32 %v2457_v43, %v793_v57 }
 0xa76   :  { %v911_v59 = vrot.slane %v2887_v58, 2  ;;  %v904_v60 = vpop.permute.xlu1 %903 }
 0xa77   :  { %v906_v61 = vmul.f32 %v2459_v45, %v904_v60 }
 0xa78   :  { %912 = vrot.lane.b32.xlu1 %v911_v59, %s2576_s26 }
 0xa79   :  { %908 = vrot.lane.b32.xlu0 %v906_v61, %s2577_s3  ;;  %v1019_v62 = vrot.slane %v906_v61, 6 }
 0xa7d   :  { %1020 = vrot.lane.b32.xlu0 %v1019_v62, %s2577_s3 }
 0xaea   :  { %v913_v63 = vpop.permute.xlu1 %912 }
 0xaeb   :  { %v909_v0 = vpop.permute.xlu0 %908 }
 0xaec   :  { %v915_v4 = vsel %vm160_vm3, %v909_v0, %v913_v63 }
 0xaed   :  { %v917_v5 = vrot.slane %v915_v4, 6 }
 0xaef   :  { %2268 = vmatmul.mubr.msk.f32.vlgmr.msra.gmra.mxu1 %vm264_vm4, %v917_v5  ;;  %v1021_v9 = vpop.permute.xlu0 %1020 }
 0xaf0   :  { %2279 = vmatmul.mubr.msk.f32.vlgmr.msra.gmra.mxu0 %vm160_vm3, %v1021_v9  ;;  %2301 = vmatpush3.msra.mxu1 %v2638_v3 }
 0xaf1   :  { %2282 = vmatpush3.msra.mxu0 %v2696_v27  ;;  %2302 = vmatprep.subr.mxu1 %v2574_v1 }
 0xaf2   :  { %2283 = vmatprep.subr.mxu0 %v2574_v1  ;;  %2303 = vmatpush3.msra.mxu1 %v2650_v6 }
 0xaf3   :  { %2284 = vmatpush3.msra.mxu0 %v2698_v28  ;;  %2304 = vmatprep.subr.mxu1 %v2574_v1 }
 0xaf4   :  { %2285 = vmatprep.subr.mxu0 %v2574_v1  ;;  %2305 = vmatpush3.msra.mxu1 %v2656_v7 }
 0xaf5   :  { %2286 = vmatpush3.msra.mxu0 %v2702_v29  ;;  %2306 = vmatprep.subr.mxu1 %v2574_v1 }
 0xaf6   :  { %2287 = vmatprep.subr.mxu0 %v2574_v1  ;;  %2307 = vmatpush3.msra.mxu1 %v2664_v8 }
 0xaf7   :  { %2288 = vmatpush3.msra.mxu0 %v2706_v30  ;;  %2308 = vmatprep.mubr.msk.f32.mxu1 %vm2575_vm0, %v2574_v1 }
 0xaf8   :  { %2289 = vmatprep.subr.mxu0 %v2574_v1  ;;  %2297 = vmatprep.mubr.msk.f32.mxu0 %vm2575_vm0, %v2574_v1 }
 0xaf9   :  { %2290 = vmatpush3.msra.mxu0 %v2710_v31  ;;  %2311 = vmatprep.subr.mxu1 %v2574_v1 }
 0xafa   :  { %2291 = vmatprep.subr.mxu0 %v2574_v1 }
 0xafb   :  { %2292 = vmatpush3.msra.mxu0 %v2714_v32 }
 0xafc   :  { %2293 = vmatprep.subr.mxu0 %v2574_v1 }
 0xafd   :  { %2294 = vmatpush3.msra.mxu0 %v2718_v34 }
 0xafe   :  { %2295 = vmatprep.subr.mxu0 %v2574_v1 }
 0xaff   :  { %2296 = vmatpush3.msra.mxu0 %v2725_v35 }
 0xb00   :  { %2330 = vmatprep.subr.mxu0 %v2574_v1 }
 0xbaf   :  { %v986_v10 = vpop.f32.mrf.mxu1 }
 0xbb0   :  { %v987_v12 = vadd.f32 %v2764_v40, %v986_v10  ;;  %v1090_v14 = vpop.f32.mrf.mxu0 }
 0xbb1   :  { %v1094_v16 = vadd.f32 %v1090_v14, %v2686_v11  ;;  %v2269_v17 = vpop.f32.mrf.mxu1 }
 0xbb2   :  { %2464 = vtanh.f32 %v987_v12  ;;  %v2280_v18 = vpop.f32.mrf.mxu0  ;;  %v2004_v21 = vmul.f32 -1.442695, %v987_v12 }
 0xbb3   :  { %2466 = vtanh.f32 %v1094_v16  ;;  %v2006_v22 = vmul.f32 -1.442695, %v1094_v16 }
 0xbb4   :  { %2468 = vpow2.f32 %v2004_v21 }
 0xbb5   :  { %2470 = vpow2.f32 %v2006_v22 }
 0xbbf   :  { %v2465_v19 = vpop.eup %2464 }
 0xbc0   :  { %v2467_v20 = vpop.eup %2466  ;;  %999 = vrot.lane.b32.xlu1 %v2465_v19, %s2576_s26 }
 0xbc1   :  { %1107 = vrot.lane.b32.xlu0 %v2467_v20, %s2576_s26  ;;  %v2469_v23 = vpop.eup %2468 }
 0xbc2   :  { %v2471_v24 = vpop.eup %2470  ;;  %v993_v25 = vadd.f32 1.0, %v2469_v23 }
 0xbc3   :  { %v1098_v26 = vadd.f32 1.0, %v2471_v24 }
 0xbc4   :  { %2472 = vrcp.f32 %v993_v25 }
 0xbc5   :  { %2474 = vrcp.f32 %v1098_v26 }
 0xbd1   :  { %v2473_v33 = vpop.eup %2472 }
 0xbd2   :  { %v2475_v37 = vpop.eup %2474  ;;  %v997_v43 = vmul.f32 %v2473_v33, %v2879_v51 }
 0xbd3   :  { %v1105_v13 = vmul.f32 %v2475_v37, %v1103_v42 }
 0xc32   :  { %v1000_v36 = vpop.permute.xlu1 %999 }
 0xc33   :  { %v1002_v38 = vmul.f32 %v2473_v33, %v1000_v36  ;;  %v1108_v39 = vpop.permute.xlu0 %1107 }
 0xc34   :  { %v1110_v41 = vmul.f32 %v2475_v37, %v1108_v39 }
 0xc35   :  { %1004 = vrot.lane.b32.xlu1 %v1002_v38, %s2577_s3 }
 0xc36   :  { %1112 = vrot.lane.b32.xlu0 %v1110_v41, %s2577_s3 }
 0xca7   :  { %v1005_v44 = vpop.permute.xlu1 %1004 }
 0xca8   :  { %v2932_v45 = vadd.f32 %v1005_v44, %v997_v43  ;;  %v1113_v46 = vpop.permute.xlu0 %1112 }
 0xca9   :  { %v2934_v47 = vadd.f32 %v1113_v46, %v1105_v13 }
 0xcaa   :  { %2476 = vtanh.f32 %v2932_v45 }
 0xcab   :  { %2478 = vtanh.f32 %v2934_v47  ;;  %v1316_v20 = vrot.slane %v2934_v47, 6 }
 0xcb7   :  { %v2477_v48 = vpop.eup %2476 }
 0xcb8   :  { %v2479_v49 = vpop.eup %2478  ;;  %1010 = vrot.lane.b32.xlu1 %v2477_v48, %s2576_s26  ;;  %v2536_v48 = vld [vmem:[%s3134_s2 + $0x18] sm:$0xff] }
 0xcb9   :  { %1118 = vrot.lane.b32.xlu0 %v2479_v49, %s2576_s26  ;;  %v2537_v49 = vld [vmem:[%s3134_s2 + $0x10] sm:$0xff] }
 0xd2a   :  { %v1011_v50 = vpop.permute.xlu1 %1010 }
 0xd2b   :  { %v2940_v52 = vmul.f32 %v2473_v33, %v1011_v50  ;;  %v1119_v51 = vpop.permute.xlu0 %1118 }
 0xd2c   :  { %v1121_v53 = vmul.f32 %v2475_v37, %v1119_v51 }
 0xd2d   :  { %1126 = vrot.lane.b32.xlu0 %v2940_v52, %s2576_s26 }
 0xd2e   :  { %1123 = vrot.lane.b32.xlu1 %v1121_v53, %s2577_s3 }
 0xd9f   :  { %v1127_v54 = vpop.permute.xlu0 %1126 }
 0xda0   :  { %v1124_v55 = vpop.permute.xlu1 %1123 }
 0xda1   :  { %v1129_v56 = vsel %vm160_vm3, %v1124_v55, %v1127_v54  ;;  %2309 = vmatmul.mubr.msk.f32.vlgmr.msra.gmra.mxu1 %vm160_vm3, %v1124_v55 }
 0xda2   :  { %2298 = vmatmul.mubr.msk.f32.vlgmr.msra.gmra.mxu0 %vm264_vm4, %v1129_v56  ;;  %2312 = vmatpush3.msra.mxu1 %v2696_v27 }
 0xda3   :  { %2313 = vmatprep.subr.mxu1 %v2574_v1  ;;  %2331 = vmatpush3.msra.mxu0 %v2638_v3 }
 0xda4   :  { %2314 = vmatpush3.msra.mxu1 %v2698_v28  ;;  %2332 = vmatprep.subr.mxu0 %v2574_v1 }
 0xda5   :  { %2315 = vmatprep.subr.mxu1 %v2574_v1  ;;  %2333 = vmatpush3.msra.mxu0 %v2650_v6 }
 0xda6   :  { %2316 = vmatpush3.msra.mxu1 %v2702_v29  ;;  %2334 = vmatprep.subr.mxu0 %v2574_v1 }
 0xda7   :  { %2317 = vmatprep.subr.mxu1 %v2574_v1  ;;  %2335 = vmatpush3.msra.mxu0 %v2656_v7 }
 0xda8   :  { %2318 = vmatpush3.msra.mxu1 %v2706_v30  ;;  %2336 = vmatprep.subr.mxu0 %v2574_v1 }
 0xda9   :  { %2319 = vmatprep.subr.mxu1 %v2574_v1  ;;  %2327 = vmatprep.mubr.msk.f32.mxu1 %vm2575_vm0, %v2574_v1 }
 0xdaa   :  { %2320 = vmatpush3.msra.mxu1 %v2710_v31  ;;  %2337 = vmatpush3.msra.mxu0 %v2664_v8 }
 0xdab   :  { %2321 = vmatprep.subr.mxu1 %v2574_v1  ;;  %2338 = vmatprep.mubr.msk.f32.mxu0 %vm2575_vm0, %v2574_v1 }
 0xdac   :  { %2322 = vmatpush3.msra.mxu1 %v2714_v32  ;;  %2341 = vmatprep.subr.mxu0 %v2574_v1 }
 0xdad   :  { %2323 = vmatprep.subr.mxu1 %v2574_v1 }
 0xdae   :  { %2324 = vmatpush3.msra.mxu1 %v2718_v34 }
 0xdaf   :  { %2325 = vmatprep.subr.mxu1 %v2574_v1 }
 0xdb0   :  { %2326 = vmatpush3.msra.mxu1 %v2725_v35 }
 0xdb1   :  { %2360 = vmatprep.subr.mxu1 %v2574_v1 }
 0xe61   :  { %v1300_v3 = vpop.f32.mrf.mxu1 }
 0xe62   :  { %v1305_v6 = vrot.slane %v1300_v3, 6  ;;  %v1199_v7 = vpop.f32.mrf.mxu0 }
 0xe63   :  { %v1200_v8 = vadd.f32 %v2764_v40, %v1199_v7  ;;  %v2310_v57 = vpop.f32.mrf.mxu1 }
 0xe64   :  { %v1307_v59 = vadd.f32 %v1305_v6, %v2686_v11  ;;  %v2299_v60 = vpop.f32.mrf.mxu0 }
 0xe65   :  { %2480 = vtanh.f32 %v1200_v8  ;;  %v2008_v63 = vmul.f32 -1.442695, %v1200_v8 }
 0xe66   :  { %2482 = vtanh.f32 %v1307_v59  ;;  %v2010_v0 = vmul.f32 -1.442695, %v1307_v59 }
 0xe67   :  { %2484 = vpow2.f32 %v2008_v63 }
 0xe68   :  { %2486 = vpow2.f32 %v2010_v0 }
 0xe72   :  { %v2481_v61 = vpop.eup %2480 }
 0xe73   :  { %v2483_v62 = vpop.eup %2482  ;;  %1212 = vrot.lane.b32.xlu1 %v2481_v61, %s2576_s26 }
 0xe74   :  { %1320 = vrot.lane.b32.xlu0 %v2483_v62, %s2576_s26  ;;  %v2485_v4 = vpop.eup %2484 }
 0xe75   :  { %v2487_v5 = vpop.eup %2486  ;;  %v1206_v9 = vadd.f32 1.0, %v2485_v4 }
 0xe76   :  { %v1311_v10 = vadd.f32 1.0, %v2487_v5 }
 0xe77   :  { %2488 = vrcp.f32 %v1206_v9 }
 0xe78   :  { %2490 = vrcp.f32 %v1311_v10 }
 0xe84   :  { %v2489_v12 = vpop.eup %2488 }
 0xe85   :  { %v2491_v16 = vpop.eup %2490  ;;  %v1210_v21 = vmul.f32 %v2489_v12, %v2932_v45 }
 0xe86   :  { %v1318_v23 = vmul.f32 %v2491_v16, %v1316_v20 }
 0xee5   :  { %v1213_v14 = vpop.permute.xlu1 %1212 }
 0xee6   :  { %v1215_v17 = vmul.f32 %v2489_v12, %v1213_v14  ;;  %v1321_v18 = vpop.permute.xlu0 %1320 }
 0xee7   :  { %v1323_v19 = vmul.f32 %v2491_v16, %v1321_v18 }
 0xee8   :  { %1217 = vrot.lane.b32.xlu1 %v1215_v17, %s2577_s3 }
 0xee9   :  { %1325 = vrot.lane.b32.xlu0 %v1323_v19, %s2577_s3 }
 0xf5a   :  { %v1218_v22 = vpop.permute.xlu1 %1217 }
 0xf5b   :  { %v2984_v24 = vadd.f32 %v1218_v22, %v1210_v21  ;;  %v1326_v25 = vpop.permute.xlu0 %1325 }
 0xf5c   :  { %v2986_v26 = vadd.f32 %v1326_v25, %v1318_v23 }
 0xf5d   :  { %2492 = vtanh.f32 %v2984_v24 }
 0xf5e   :  { %2494 = vtanh.f32 %v2986_v26  ;;  %v1534_v0 = vrot.slane %v2986_v26, 6 }
 0xf6a   :  { %v2493_v33 = vpop.eup %2492 }
 0xf6b   :  { %v2495_v36 = vpop.eup %2494  ;;  %1223 = vrot.lane.b32.xlu1 %v2493_v33, %s2576_s26 }
 0xf6c   :  { %1331 = vrot.lane.b32.xlu0 %v2495_v36, %s2576_s26  ;;  %v2540_v36 = vld [vmem:[#allocation4 + $0x38] sm:$0xff] }
 0xfdd   :  { %v1224_v37 = vpop.permute.xlu1 %1223 }
 0xfde   :  { %v2992_v38 = vmul.f32 %v2489_v12, %v1224_v37  ;;  %v1332_v39 = vpop.permute.xlu0 %1331  ;;  %v2541_v37 = vld [vmem:[#allocation4 + $0x30] sm:$0xff] }
 0xfdf   :  { %v1334_v41 = vmul.f32 %v2491_v16, %v1332_v39  ;;  %v2542_v39 = vld [vmem:[#allocation4 + $0x28] sm:$0xff] }
 0xfe0   :  { %v1339_v42 = vrot.slane %v2992_v38, 6 }
 0xfe1   :  { %1336 = vrot.lane.b32.xlu1 %v1334_v41, %s2577_s3  ;;  %v1447_v43 = vrot.slane %v1334_v41, 2  ;;  %v2543_v41 = vld [vmem:[#allocation4 + $0x20] sm:$0xff] }
 0xfe2   :  { %1340 = vrot.lane.b32.xlu0 %v1339_v42, %s2576_s26  ;;  %v2544_v42 = vld [vmem:[#allocation4 + $0x18] sm:$0xff] }
 0xfe5   :  { %1448 = vrot.lane.b32.xlu1 %v1447_v43, %s2577_s3  ;;  %v2545_v43 = vld [vmem:[#allocation4 + $0x10] sm:$0xff] }
0x1053   :  { %v1337_v44 = vpop.permute.xlu1 %1336 }
0x1054   :  { %v1341_v13 = vpop.permute.xlu0 %1340 }
0x1055   :  { %v1343_v45 = vsel %vm160_vm3, %v1337_v44, %v1341_v13  ;;  %v2546_v44 = vld [vmem:[#allocation4 + $0x8] sm:$0xff]  ;;  %v2547_v13 = vld [vmem:[#allocation4] sm:$0xff] }
0x1056   :  { %v1345_v46 = vrot.slane %v1343_v45, 2 }
0x1057   :  { %v1449_v47 = vpop.permute.xlu1 %1448 }
0x1058   :  { %2328 = vmatmul.mubr.msk.f32.vlgmr.msra.gmra.mxu1 %vm264_vm4, %v1345_v46  ;;  %2339 = vmatmul.mubr.msk.f32.vlgmr.msra.gmra.mxu0 %vm160_vm3, %v1449_v47 }
0x1059   :  { %2342 = vmatpush3.msra.mxu0 %v2696_v27  ;;  %2361 = vmatpush3.msra.mxu1 %v2536_v48  ;;  %v2538_v27 = vld [vmem:[%s3134_s2 + $0x8] sm:$0xff] }
0x105a   :  { %2343 = vmatprep.subr.mxu0 %v2574_v1  ;;  %2362 = vmatprep.subr.mxu1 %v2574_v1 }
0x105b   :  { %2344 = vmatpush3.msra.mxu0 %v2698_v28  ;;  %2363 = vmatpush3.msra.mxu1 %v2537_v49  ;;  %v2539_v28 = vld [vmem:[%s3134_s2] sm:$0xff] }
0x105c   :  { %2345 = vmatprep.subr.mxu0 %v2574_v1  ;;  %2364 = vmatprep.subr.mxu1 %v2574_v1 }
0x105d   :  { %2346 = vmatpush3.msra.mxu0 %v2702_v29  ;;  %2365 = vmatpush3.msra.mxu1 %v2538_v27 }
0x105e   :  { %2347 = vmatprep.subr.mxu0 %v2574_v1  ;;  %2357 = vmatprep.mubr.msk.f32.mxu0 %vm2575_vm0, %v2574_v1 }
0x105f   :  { %2348 = vmatpush3.msra.mxu0 %v2706_v30  ;;  %2366 = vmatprep.subr.mxu1 %v2574_v1 }
0x1060   :  { %2349 = vmatprep.subr.mxu0 %v2574_v1  ;;  %2367 = vmatpush3.msra.mxu1 %v2539_v28 }
0x1061   :  { %2350 = vmatpush3.msra.mxu0 %v2710_v31  ;;  %2368 = vmatprep.mubr.msk.f32.mxu1 %vm2575_vm0, %v2574_v1 }
0x1062   :  { %2351 = vmatprep.subr.mxu0 %v2574_v1  ;;  %2371 = vmatprep.subr.mxu1 %v2574_v1 }
0x1063   :  { %2352 = vmatpush3.msra.mxu0 %v2714_v32 }
0x1064   :  { %2353 = vmatprep.subr.mxu0 %v2574_v1 }
0x1065   :  { %2354 = vmatpush3.msra.mxu0 %v2718_v34 }
0x1066   :  { %2355 = vmatprep.subr.mxu0 %v2574_v1 }
0x1067   :  { %2356 = vmatpush3.msra.mxu0 %v2725_v35 }
0x1118   :  { %v1414_v29 = vpop.f32.mrf.mxu1  ;;  %v1518_v30 = vpop.f32.mrf.mxu0 }
0x1119   :  { %v1415_v31 = vadd.f32 %v2764_v40, %v1414_v29  ;;  %v1523_v50 = vrot.slane %v1518_v30, 4 }
0x111a   :  { %v2329_v51 = vpop.f32.mrf.mxu1  ;;  %v2340_v53 = vpop.f32.mrf.mxu0 }
0x111b   :  { %2496 = vtanh.f32 %v1415_v31  ;;  %v1525_v54 = vadd.f32 %v1523_v50, %v2686_v11  ;;  %v2012_v34 = vmul.f32 -1.442695, %v1415_v31 }
0x111d   :  { %2498 = vtanh.f32 %v1525_v54  ;;  %v2014_v56 = vmul.f32 -1.442695, %v1525_v54 }
0x111e   :  { %2500 = vpow2.f32 %v2012_v34 }
0x111f   :  { %2502 = vpow2.f32 %v2014_v56 }
0x1128   :  { %v2497_v32 = vpop.eup %2496 }
0x1129   :  { %1427 = vrot.lane.b32.xlu0 %v2497_v32, %s2576_s26 }
0x112a   :  { %v2499_v55 = vpop.eup %2498 }
0x112b   :  { %1538 = vrot.lane.b32.xlu1 %v2499_v55, %s2576_s26  ;;  %v2501_v35 = vpop.eup %2500 }
0x112c   :  { %v2503_v3 = vpop.eup %2502  ;;  %v1421_v6 = vadd.f32 1.0, %v2501_v35 }
0x112d   :  { %v1529_v7 = vadd.f32 1.0, %v2503_v3 }
0x112e   :  { %2504 = vrcp.f32 %v1421_v6 }
0x112f   :  { %2506 = vrcp.f32 %v1529_v7 }
0x113b   :  { %v2505_v8 = vpop.eup %2504 }
0x113c   :  { %v2507_v60 = vpop.eup %2506  ;;  %v1425_v63 = vmul.f32 %v2505_v8, %v2984_v24 }
0x113d   :  { %v1536_v9 = vmul.f32 %v2507_v60, %v1534_v0 }
0x119b   :  { %v1428_v57 = vpop.permute.xlu0 %1427 }
0x119c   :  { %v1430_v59 = vmul.f32 %v2505_v8, %v1428_v57 }
0x119d   :  { %v1539_v61 = vpop.permute.xlu1 %1538 }
0x119e   :  { %1432 = vrot.lane.b32.xlu0 %v1430_v59, %s2577_s3  ;;  %v1541_v62 = vmul.f32 %v2507_v60, %v1539_v61 }
0x11a0   :  { %1543 = vrot.lane.b32.xlu1 %v1541_v62, %s2577_s3 }
0x1210   :  { %v1433_v4 = vpop.permute.xlu0 %1432 }
0x1211   :  { %v3044_v5 = vadd.f32 %v1433_v4, %v1425_v63 }
0x1212   :  { %v1544_v10 = vpop.permute.xlu1 %1543 }
0x1213   :  { %2508 = vtanh.f32 %v3044_v5  ;;  %v3047_v12 = vadd.f32 %v1544_v10, %v1536_v9 }
0x1215   :  { %2510 = vtanh.f32 %v3047_v12  ;;  %v1752_v3 = vrot.slane %v3047_v12, 6 }
0x1220   :  { %v2509_v14 = vpop.eup %2508 }
0x1221   :  { %1438 = vrot.lane.b32.xlu0 %v2509_v14, %s2576_s26 }
0x1222   :  { %v2511_v16 = vpop.eup %2510 }
0x1223   :  { %1549 = vrot.lane.b32.xlu1 %v2511_v16, %s2576_s26 }
0x1293   :  { %v1439_v17 = vpop.permute.xlu0 %1438 }
0x1294   :  { %v3052_v18 = vmul.f32 %v2505_v8, %v1439_v17  ;;  %v2548_v17 = vld [vmem:[%s3137_s5] ss:$0 sm:$0xff] }
0x1295   :  { %v1550_v20 = vpop.permute.xlu1 %1549 }
0x1296   :  { %v1557_v19 = vrot.slane %v3052_v18, 4  ;;  %v1552_v21 = vmul.f32 %v2507_v60, %v1550_v20 }
0x1298   :  { %1558 = vrot.lane.b32.xlu1 %v1557_v19, %s2576_s26  ;;  %1554 = vrot.lane.b32.xlu0 %v1552_v21, %s2577_s3  ;;  %v1665_v22 = vrot.slane %v1552_v21, 4 }
0x129c   :  { %1666 = vrot.lane.b32.xlu0 %v1665_v22, %s2577_s3 }
0x130a   :  { %v1559_v23 = vpop.permute.xlu1 %1558  ;;  %v1555_v24 = vpop.permute.xlu0 %1554 }
0x130b   :  { %v1561_v25 = vsel %vm160_vm3, %v1555_v24, %v1559_v23 }
0x130c   :  { %v1563_v26 = vrot.slane %v1561_v25, 4 }
0x130e   :  { %v1667_v33 = vpop.permute.xlu0 %1666  ;;  %2358 = vmatmul.mubr.msk.f32.vlgmr.msra.gmra.mxu0 %vm264_vm4, %v1563_v26 }
0x130f   :  { %2369 = vmatmul.mubr.msk.f32.vlgmr.msra.gmra.mxu1 %vm160_vm3, %v1667_v33 }
0x1310   :  { %2372 = vmatpush3.msra.mxu1 %v2540_v36  ;;  %2387 = vmatprep.mubr.msk.f32.mxu1 %vm2575_vm0, %v2574_v1 }
0x1311   :  { %2373 = vmatprep.subr.mxu1 %v2574_v1 }
0x1312   :  { %2374 = vmatpush3.msra.mxu1 %v2541_v37 }
0x1313   :  { %2375 = vmatprep.subr.mxu1 %v2574_v1 }
0x1314   :  { %2376 = vmatpush3.msra.mxu1 %v2542_v39 }
0x1315   :  { %2377 = vmatprep.subr.mxu1 %v2574_v1 }
0x1316   :  { %2378 = vmatpush3.msra.mxu1 %v2543_v41 }
0x1317   :  { %2379 = vmatprep.subr.mxu1 %v2574_v1 }
0x1318   :  { %2380 = vmatpush3.msra.mxu1 %v2544_v42 }
0x1319   :  { %2381 = vmatprep.subr.mxu1 %v2574_v1 }
0x131a   :  { %2382 = vmatpush3.msra.mxu1 %v2545_v43 }
0x131b   :  { %2383 = vmatprep.subr.mxu1 %v2574_v1 }
0x131c   :  { %2384 = vmatpush3.msra.mxu1 %v2546_v44  ;;  %v1887_v44 = vld [vmem:[%s3138_s6 + $0x10] sm:$0xff] }
0x131d   :  { %2385 = vmatprep.subr.mxu1 %v2574_v1 }
0x131e   :  { %2386 = vmatpush3.msra.mxu1 %v2547_v13 }
0x13ce   :  { %v1632_v45 = vpop.f32.mrf.mxu0 }
0x13cf   :  { %v1633_v46 = vadd.f32 %v2764_v40, %v1632_v45  ;;  %v1736_v47 = vpop.f32.mrf.mxu1 }
0x13d0   :  { %v1741_v48 = vrot.slane %v1736_v47, 2  ;;  %v2359_v49 = vpop.f32.mrf.mxu0 }
0x13d1   :  { %2512 = vtanh.f32 %v1633_v46  ;;  %v2370_v27 = vpop.f32.mrf.mxu1  ;;  %v2016_v1 = vmul.f32 -1.442695, %v1633_v46 }
0x13d2   :  { %v1743_v28 = vadd.f32 %v1741_v48, %v2686_v11 }
0x13d4   :  { %2514 = vtanh.f32 %v1743_v28  ;;  %v2018_v31 = vmul.f32 -1.442695, %v1743_v28  ;;  %v2021_v28 = vld [vmem:[#allocation3] ss:$0 sm:$0xff] }
0x13d5   :  { %2516 = vpow2.f32 %v2016_v1 }
0x13d6   :  { %2518 = vpow2.f32 %v2018_v31 }
0x13de   :  { %v2513_v29 = vpop.eup %2512 }
0x13df   :  { %1645 = vrot.lane.b32.xlu1 %v2513_v29, %s2576_s26 }
0x13e1   :  { %v2515_v30 = vpop.eup %2514 }
0x13e2   :  { %1756 = vrot.lane.b32.xlu0 %v2515_v30, %s2576_s26  ;;  %v2517_v50 = vpop.eup %2516 }
0x13e3   :  { %v2519_v40 = vpop.eup %2518  ;;  %v1639_v51 = vadd.f32 1.0, %v2517_v50 }
0x13e4   :  { %v1747_v53 = vadd.f32 1.0, %v2519_v40 }
0x13e5   :  { %2520 = vrcp.f32 %v1639_v51 }
0x13e6   :  { %2522 = vrcp.f32 %v1747_v53 }
0x13f2   :  { %v2521_v54 = vpop.eup %2520 }
0x13f3   :  { %v2523_v55 = vpop.eup %2522  ;;  %v1643_v35 = vmul.f32 %v2521_v54, %v3044_v5 }
0x13f4   :  { %v1754_v8 = vmul.f32 %v2523_v55, %v1752_v3 }
0x1451   :  { %v1646_v32 = vpop.permute.xlu1 %1645 }
0x1452   :  { %v1648_v11 = vmul.f32 %v2521_v54, %v1646_v32 }
0x1454   :  { %v1757_v34 = vpop.permute.xlu0 %1756  ;;  %1650 = vrot.lane.b32.xlu1 %v1648_v11, %s2577_s3 }
0x1455   :  { %v1759_v56 = vmul.f32 %v2523_v55, %v1757_v34 }
0x1457   :  { %1761 = vrot.lane.b32.xlu0 %v1759_v56, %s2577_s3 }
0x14c6   :  { %v1651_v6 = vpop.permute.xlu1 %1650 }
0x14c7   :  { %v1653_v7 = vadd.f32 %v1651_v6, %v1643_v35 }
0x14c9   :  { %2524 = vtanh.f32 %v1653_v7  ;;  %v1762_v57 = vpop.permute.xlu0 %1761 }
0x14ca   :  { %v1764_v59 = vadd.f32 %v1762_v57, %v1754_v8 }
0x14cc   :  { %2526 = vtanh.f32 %v1764_v59 }
0x14d6   :  { %v2525_v60 = vpop.eup %2524 }
0x14d7   :  { %1656 = vrot.lane.b32.xlu1 %v2525_v60, %s2576_s26 }
0x14d9   :  { %v2527_v61 = vpop.eup %2526 }
0x14da   :  { %1767 = vrot.lane.b32.xlu0 %v2527_v61, %s2576_s26 }
0x1549   :  { %v1657_v62 = vpop.permute.xlu1 %1656 }
0x154a   :  { %v1659_v63 = vmul.f32 %v2521_v54, %v1657_v62 }
0x154c   :  { %v1775_v0 = vrot.slane %v1659_v63, 2  ;;  %v1768_v4 = vpop.permute.xlu0 %1767 }
0x154d   :  { %v1770_v5 = vmul.f32 %v2523_v55, %v1768_v4 }
0x154e   :  { %1776 = vrot.lane.b32.xlu0 %v1775_v0, %s2576_s26 }
0x154f   :  { %1772 = vrot.lane.b32.xlu1 %v1770_v5, %s2577_s3 }
0x15c0   :  { %v1777_v9 = vpop.permute.xlu0 %1776 }
0x15c1   :  { %v1773_v10 = vpop.permute.xlu1 %1772 }
0x15c2   :  { %v1779_v12 = vsel %vm160_vm3, %v1773_v10, %v1777_v9 }
0x15c3   :  { %v1781_v14 = vrot.slane %v1779_v12, 6 }
0x15c5   :  { %2388 = vmatmul.mubr.msk.f32.vlgmr.msra.gmra.mxu1 %vm264_vm4, %v1781_v14 }
0x1685   :  { %v1850_v16 = vpop.f32.mrf.mxu1 }
0x1686   :  { %v1851_v19 = vadd.f32 %v2548_v17, %v1850_v16 }
0x1687   :  { %v2389_v20 = vpop.f32.mrf.mxu1 }
0x1688   :  { %2528 = vtanh.f32 %v1851_v19  ;;  %v2020_v22 = vmul.f32 -1.442695, %v1851_v19 }
0x168a   :  { %2530 = vpow2.f32 %v2020_v22 }
0x1695   :  { %v2529_v21 = vpop.eup %2528 }
0x1696   :  { %1863 = vrot.lane.b32.xlu1 %v2529_v21, %s2576_s26 }
0x1697   :  { %v2531_v23 = vpop.eup %2530 }
0x1698   :  { %v1857_v24 = vadd.f32 1.0, %v2531_v23 }
0x169a   :  { %2532 = vrcp.f32 %v1857_v24 }
0x16a7   :  { %v2533_v25 = vpop.eup %2532 }
0x16a8   :  { %v1861_v36 = vmul.f32 %v2533_v25, %v1653_v7 }
0x1708   :  { %v1864_v26 = vpop.permute.xlu1 %1863 }
0x1709   :  { %v1866_v33 = vmul.f32 %v2533_v25, %v1864_v26 }
0x170b   :  { %1868 = vrot.lane.b32.xlu0 %v1866_v33, %s2577_s3 }
0x170f   :  { %363 = vrot.lane.b32.xlu0 %v2781_v15, %s2577_s3 }
0x1713   :  { %797 = vrot.lane.b32.xlu0 %v2887_v58, %s2577_s3 }
0x1717   :  { %1228 = vrot.lane.b32.xlu0 %v2992_v38, %s2577_s3  ;;  %v1888_v38 = vld [vmem:[%s3138_s6 + $0x18] sm:$0xff] }
0x1718   :  { %2390 = vmatprep.subr.mxu0 %v1888_v38 }
0x1719   :  { %2391 = vmatpush3.msra.mxu0 %v1888_v38 }
0x171a   :  { %2392 = vmatprep.subr.mxu0 %v1887_v44 }
0x171b   :  { %1661 = vrot.lane.b32.xlu0 %v1659_v63, %s2577_s3  ;;  %2393 = vmatpush3.msra.mxu0 %v1887_v44 }
0x177d   :  { %v1869_v37 = vpop.permute.xlu0 %1868 }
0x177e   :  { %v1871_v39 = vadd.f32 %v1869_v37, %v1861_v36 }
0x1780   :  { %2534 = vtanh.f32 %v1871_v39 }
0x1781   :  { %v364_v41 = vpop.permute.xlu0 %363 }
0x1782   :  { %367 = vst.msk [vmem:[#allocation2] sm:$0x3] %vm366_vm5, %v364_v41 }
0x1785   :  { %v798_v42 = vpop.permute.xlu0 %797 }
0x1786   :  { %800 = vst.msk [vmem:[#allocation2 + $0x4] sm:$0x3] %vm366_vm5, %v798_v42 }
0x1789   :  { %v1229_v15 = vpop.permute.xlu0 %1228 }
0x178a   :  { %1231 = vst.msk [vmem:[#allocation2 + $0x8] sm:$0x3] %vm366_vm5, %v1229_v15 }
0x178d   :  { %v2535_v58 = vpop.eup %2534  ;;  %v1662_v43 = vpop.permute.xlu0 %1661 }
0x178e   :  { %1664 = vst.msk [vmem:[#allocation2 + $0xc] sm:$0x3] %vm366_vm5, %v1662_v43  ;;  %1874 = vrot.lane.b32.xlu1 %v2535_v58, %s2576_s26 }
0x1792   :  { %579 = vrot.lane.b32.xlu1 %v2834_v2, %s2577_s3  ;;  %v1886_v2 = vld [vmem:[%s3138_s6 + $0x8] sm:$0xff] }
0x1793   :  { %2394 = vmatprep.subr.mxu0 %v1886_v2 }
0x1794   :  { %2395 = vmatpush3.msra.mxu0 %v1886_v2 }
0x1796   :  { %1015 = vrot.lane.b32.xlu1 %v2940_v52, %s2577_s3  ;;  %v1885_v52 = vld [vmem:[%s3138_s6] sm:$0xff] }
0x1797   :  { %2396 = vmatprep.subr.mxu0 %v1885_v52 }
0x1798   :  { %2397 = vmatpush3.msra.mxu0 %v1885_v52 }
0x179a   :  { %1443 = vrot.lane.b32.xlu1 %v3052_v18, %s2577_s3 }
0x1800   :  { %v1875_v18 = vpop.permute.xlu1 %1874 }
0x1801   :  { %v1877_v13 = vmul.f32 %v2533_v25, %v1875_v18 }
0x1803   :  { %1879 = vrot.lane.b32.xlu1 %v1877_v13, %s2577_s3 }
0x1804   :  { %v580_v45 = vpop.permute.xlu1 %579 }
0x1805   :  { %582 = vst.msk [vmem:[#allocation2 + $0x2] sm:$0x3] %vm366_vm5, %v580_v45 }
0x1808   :  { %v1016_v46 = vpop.permute.xlu1 %1015 }
0x1809   :  { %1018 = vst.msk [vmem:[#allocation2 + $0x6] sm:$0x3] %vm366_vm5, %v1016_v46 }
0x180c   :  { %v1444_v47 = vpop.permute.xlu1 %1443 }
0x180d   :  { %1446 = vst.msk [vmem:[#allocation2 + $0xa] sm:$0x3] %vm366_vm5, %v1444_v47 }
0x1810   :  { %v1883_v48 = vld [vmem:[#allocation2] sm:$0xff] }
0x1811   :  { %2398 = vmatprep.mubr.msk.f32.mxu0 %vm160_vm3, %v1883_v48 }
0x1875   :  { %v1880_v49 = vpop.permute.xlu1 %1879 }
0x1876   :  { %1882 = vst.msk [vmem:[#allocation2 + $0xe] sm:$0x3] %vm366_vm5, %v1880_v49 }
0x187d   :  { %v1884_v27 = vld [vmem:[#allocation2 + $0x8] sm:$0xff] }
0x187e   :  { %2399 = vmatmul.mubr.msk.f32.vlgmr.msra.gmra.mxu0 %vm160_vm3, %v1884_v27 }
0x193e   :  { %v2400_v29 = vpop.f32.mrf.mxu0 }
0x193f   :  { %v1974_v30 = vadd.f32 %v2400_v29, %v2021_v28 }
0x1940   :  { %v1968_v1 = vpop.f32.mrf.mxu0 }
0x1941   :  { %1979 = vst.msk [vmem:[%s3140_s8 + $0x8] sm:$0xff] %vm1977_vm6, %v1974_v30  ;;  %v1969_v31 = vadd.f32 %v2021_v28, %v1968_v1 }
0x1943   :  { %1978 = vst.msk [vmem:[%s3140_s8] sm:$0xff] %vm1977_vm6, %v1969_v31 }
0x1944   :  { %1984 = vsyncpa [#allocation5], 1 }

</bundles_post_ra>
